<compile_context>
chip_gen: v6e
topology: v6e:2x2x1
jax: 0.10.0
libtpu: 0.0.40
codegen_flags: <defaults>
</compile_context>

<pallas_src>
import functools
import math

import jax
import jax.numpy as jnp
from jax import lax
from jax.experimental import pallas as pl
from jax.experimental.pallas import tpu as pltpu

EPS = 1e-5
KSIZE = 3                    # kernel_size=3, padding=1, stride=1 => 'same'
MXU_DTYPE = jnp.bfloat16     # MXU feed dtype (accumulation stays f32)
STORE_DTYPE = jnp.bfloat16   # inter-pass activation (h1) storage dtype

# Raise the scoped-VMEM budget (default 16/32 MiB) so full-(C, L) tiles keep
# their double buffers at realistic VDCNN shapes; 64 MiB == v7x physical VMEM.
# TODO(synk): for very large C*L on v7x, tile L with a 1-column halo instead
# of relying on full-length tiles (the in-kernel roll padding needs the halo).
_COMPILER_PARAMS = pltpu.CompilerParams(
    dimension_semantics=("parallel",),     # batch axis shards across megacore
    vmem_limit_bytes=64 * 1024 * 1024,
)


# ----------------------------- kernel helpers ------------------------------
def _border_masks(c, l):
    lane = lax.broadcasted_iota(jnp.int32, (c, l), 1)
    return lane == 0, lane == l - 1


def _conv3_same(x32, taps, b_col, first, last):
    """K=3, padding=1 'same' conv of one (C, L) tile.

    Three tap-sliced bf16 MXU dots with f32 accumulation; no im2col concat
    temporary.  Tap ordering ties to the (K, Cout, Cin) weight transpose in
    the wrapper: taps[0] multiplies x[:, l-1], taps[2] multiplies x[:, l+1].
    The wrapped-in border column of each roll is masked to zero, which is
    exactly the conv's zero padding, done in-kernel (no jnp.pad HBM pass).
    """
    w0, w1, w2 = taps
    l = x32.shape[1]
    x_m1 = jnp.where(first, 0.0, pltpu.roll(x32, 1, 1))       # x[:, l-1]
    x_p1 = jnp.where(last, 0.0, pltpu.roll(x32, l - 1, 1))    # x[:, l+1]
    y = jnp.dot(w0, x_m1.astype(MXU_DTYPE), preferred_element_type=jnp.float32)
    y = y + jnp.dot(w1, x32.astype(MXU_DTYPE), preferred_element_type=jnp.float32)
    y = y + jnp.dot(w2, x_p1.astype(MXU_DTYPE), preferred_element_type=jnp.float32)
    return y + b_col


def _row_stats(y32, inv_l):
    """Per-channel [sum, row-centered sum-of-squares] over L (fused with the
    producing pass — no re-read).  Row-centering + host-side Chan merge avoids
    the catastrophic cancellation of the E[x^2]-E[x]^2 form."""
    s = jnp.sum(y32, axis=1, keepdims=True)              # (C, 1)
    d = y32 - s * inv_l
    m2 = jnp.sum(d * d, axis=1, keepdims=True)           # (C, 1)
    return jnp.concatenate([s, m2], axis=1)              # (C, 2)


# -------------------------------- kernels ----------------------------------
def _conv1_kernel(x_ref, w_ref, b_ref, h_ref, s_ref, *, bt, inv_l):
    _, cin, l = x_ref.shape
    first, last = _border_masks(cin, l)
    taps = (w_ref[0], w_ref[1], w_ref[2])
    bias = b_ref[...]
    for b in range(bt):                                   # unrolled, bt small
        y = _conv3_same(x_ref[b], taps, bias, first, last)
        h = y.astype(h_ref.dtype)                         # bf16 storage
        h_ref[b] = h
        # stats on the value downstream passes actually read (bf16-rounded)
        s_ref[b] = _row_stats(h.astype(jnp.float32), inv_l)


def _bn1_relu_conv2_stats_kernel(h_ref, a_ref, c_ref, w_ref, b_ref, s_ref,
                                 *, bt, inv_l):
    _, c, l = h_ref.shape
    first, last = _border_masks(c, l)
    taps = (w_ref[0], w_ref[1], w_ref[2])
    bias = b_ref[...]
    a1 = a_ref[...]
    c1 = c_ref[...]
    for b in range(bt):
        z = jnp.maximum(a1 * h_ref[b].astype(jnp.float32) + c1, 0.0)
        y = _conv3_same(z, taps, bias, first, last)       # f32, not stored
        s_ref[b] = _row_stats(y, inv_l)


def _bn1_relu_conv2_bn2_res_relu_kernel(*refs, bt, shortcut):
    if shortcut:
        h_ref, a1_ref, c1_ref, w_ref, b_ref, a2_ref, c2_ref, x_ref, o_ref = refs
    else:
        h_ref, a1_ref, c1_ref, w_ref, b_ref, a2_ref, c2_ref, o_ref = refs
    _, c, l = h_ref.shape
    first, last = _border_masks(c, l)
    taps = (w_ref[0], w_ref[1], w_ref[2])
    bias = b_ref[...]
    a1, c1 = a1_ref[...], c1_ref[...]
    a2, c2 = a2_ref[...], c2_ref[...]
    for b in range(bt):
        # recompute conv2 (identical to pass 2 -> stats are exactly consistent)
        z = jnp.maximum(a1 * h_ref[b].astype(jnp.float32) + c1, 0.0)
        y = _conv3_same(z, taps, bias, first, last)
        y = a2 * y + c2                                   # BN2 affine
        if shortcut:
            y = y + x_ref[b]
        o_ref[b] = jnp.maximum(y, 0.0)


# ------------------------------ pallas wrappers -----------------------------
def _batch_spec(shape):
    return pl.BlockSpec(shape, lambda i: (i,) + (0,) * (len(shape) - 1))


def _const_spec(shape):
    return pl.BlockSpec(shape, lambda i: (0,) * len(shape))


def _nbytes(shape, dtype):
    return math.prod(shape) * jnp.dtype(dtype).itemsize


def _pick_batch_tile(b, max_bt=8):
    """Rows per grid step: amortize the ~0.35us/step overhead and reuse the
    resident weights, while keeping >=2 parallel steps (v7x 2-core megacore)
    when the batch allows it."""
    divs = [d for d in range(1, min(b, max_bt) + 1) if b % d == 0]
    for d in reversed(divs):
        if b // d >= 2:
            return d
    return divs[-1]


def _pass1_conv_stats(x, w3, b_col, bt):
    B, cin, L = x.shape
    cout = w3.shape[1]
    bytes_acc = (_nbytes((B, cin, L), jnp.float32) + _nbytes(w3.shape, w3.dtype)
                 + _nbytes(b_col.shape, b_col.dtype)
                 + _nbytes((B, cout, L), STORE_DTYPE)
                 + _nbytes((B, cout, 2), jnp.float32))
    return pl.pallas_call(
        functools.partial(_conv1_kernel, bt=bt, inv_l=1.0 / L),
        grid=(B // bt,),
        in_specs=[_batch_spec((bt, cin, L)), _const_spec(w3.shape),
                  _const_spec(b_col.shape)],
        out_specs=(_batch_spec((bt, cout, L)), _batch_spec((bt, cout, 2))),
        out_shape=(jax.ShapeDtypeStruct((B, cout, L), STORE_DTYPE),
                   jax.ShapeDtypeStruct((B, cout, 2), jnp.float32)),
        compiler_params=_COMPILER_PARAMS,
        cost_estimate=pl.CostEstimate(flops=2 * KSIZE * cin * cout * L * B,
                                      transcendentals=0,
                                      bytes_accessed=bytes_acc),
    )(x, w3, b_col)


def _pass2_stats(h1, a1, c1, w3, b_col, bt):
    B, c, L = h1.shape
    cout = w3.shape[1]
    bytes_acc = (_nbytes((B, c, L), STORE_DTYPE) + _nbytes(w3.shape, w3.dtype)
                 + 3 * _nbytes((cout, 1), jnp.float32)
                 + _nbytes((B, cout, 2), jnp.float32))
    return pl.pallas_call(
        functools.partial(_bn1_relu_conv2_stats_kernel, bt=bt, inv_l=1.0 / L),
        grid=(B // bt,),
        in_specs=[_batch_spec((bt, c, L)), _const_spec(a1.shape),
                  _const_spec(c1.shape), _const_spec(w3.shape),
                  _const_spec(b_col.shape)],
        out_specs=_batch_spec((bt, cout, 2)),
        out_shape=jax.ShapeDtypeStruct((B, cout, 2), jnp.float32),
        compiler_params=_COMPILER_PARAMS,
        cost_estimate=pl.CostEstimate(flops=2 * KSIZE * c * cout * L * B,
                                      transcendentals=0,
                                      bytes_accessed=bytes_acc),
    )(h1, a1, c1, w3, b_col)


def _pass3_output(h1, a1, c1, w3, b_col, a2, c2, x, bt, shortcut):
    B, c, L = h1.shape
    cout = w3.shape[1]
    args = [h1, a1, c1, w3, b_col, a2, c2]
    in_specs = [_batch_spec((bt, c, L)), _const_spec(a1.shape),
                _const_spec(c1.shape), _const_spec(w3.shape),
                _const_spec(b_col.shape), _const_spec(a2.shape),
                _const_spec(c2.shape)]
    bytes_acc = (_nbytes((B, c, L), STORE_DTYPE) + _nbytes(w3.shape, w3.dtype)
                 + 5 * _nbytes((cout, 1), jnp.float32)
                 + _nbytes((B, cout, L), jnp.float32))
    if shortcut:
        args.append(x)
        in_specs.append(_batch_spec((bt, c, L)))
        bytes_acc += _nbytes((B, c, L), jnp.float32)
    return pl.pallas_call(
        functools.partial(_bn1_relu_conv2_bn2_res_relu_kernel, bt=bt,
                          shortcut=shortcut),
        grid=(B // bt,),
        in_specs=in_specs,
        out_specs=_batch_spec((bt, cout, L)),
        out_shape=jax.ShapeDtypeStruct((B, cout, L), jnp.float32),
        compiler_params=_COMPILER_PARAMS,
        cost_estimate=pl.CostEstimate(flops=2 * KSIZE * c * cout * L * B,
                                      transcendentals=0,
                                      bytes_accessed=bytes_acc),
    )(*args)


def _bn_scale_shift(stats, gamma, beta, L):
    """Fold training-mode BN (biased batch var) into a per-channel affine a*x+c.

    stats: (B, C, 2) per batch-row [sum, row-centered M2] over L elements.
    Rows are merged with the parallel-variance (Chan) formula.
    """
    s = stats[..., 0]                              # (B, C)
    m2 = stats[..., 1]                             # (B, C)
    n = s.shape[0] * L
    mean = jnp.sum(s, axis=0) / n                  # (C,)
    row_mean = s / L
    var = (jnp.sum(m2, axis=0)
           + L * jnp.sum((row_mean - mean) ** 2, axis=0)) / n
    a = gamma.astype(jnp.float32) * lax.rsqrt(var + EPS)
    c = beta.astype(jnp.float32) - a * mean
    return a.reshape(-1, 1), c.reshape(-1, 1)


def basic_conv_res_block(x_ncl, params, *, shortcut=True):
    """x_ncl: (B, Cin, L) float32, PyTorch NCL layout (kept — L lane-dense)."""
    w1, b1, g1, be1, w2, b2, g2, be2 = params
    B, cin, L = x_ncl.shape
    cout = w1.shape[0]
    if shortcut and cin != cout:
        # TODO(synk): strided-conv `downsample` residual branch not implemented
        # (module default downsample=None requires input_dim == n_filters).
        raise NotImplementedError("shortcut requires input_dim == n_filters")

    x = x_ncl.astype(jnp.float32)
    bt = _pick_batch_tile(B)
    col = lambda v: v.reshape(-1, 1).astype(jnp.float32)
    # PyTorch Conv1d weight (Cout, Cin, K) -> tap-major (K, Cout, Cin) in bf16
    # so the kernel slices w_ref[k]: k=0 tap hits x[:, l-1], k=2 hits x[:, l+1].
    tap_major = lambda w: jnp.transpose(w, (2, 0, 1)).astype(MXU_DTYPE)
    w3_1, w3_2 = tap_major(w1), tap_major(w2)
    b1c, b2c = col(b1), col(b2)

    h1, s1 = _pass1_conv_stats(x, w3_1, b1c, bt)           # conv1 (+ stats)
    a1, c1 = _bn_scale_shift(s1, g1, be1, L)                # fold BN1
    s2 = _pass2_stats(h1, a1, c1, w3_2, b2c, bt)            # conv2 stats only
    a2, c2 = _bn_scale_shift(s2, g2, be2, L)                # fold BN2
    return _pass3_output(h1, a1, c1, w3_2, b2c, a2, c2, x, bt, shortcut)


# ---------------------------- pure-JAX reference ----------------------------
def _ref_forward(x_ncl, params, *, shortcut=True):
    w1, b1, g1, be1, w2, b2, g2, be2 = params

    def conv1d(x, w, b):
        y = lax.conv_general_dilated(x, w, window_strides=(1,),
                                     padding=((1, 1),),
                                     dimension_numbers=('NCH', 'OIH', 'NCH'))
        return y + b[None, :, None]

    def bn_train(x, g, bt):
        mu = x.mean(axis=(0, 2), keepdims=True)
        var = ((x - mu) ** 2).mean(axis=(0, 2), keepdims=True)
        return (x - mu) / jnp.sqrt(var + EPS) * g[None, :, None] + bt[None, :, None]

    out = jnp.maximum(bn_train(conv1d(x_ncl, w1, b1), g1, be1), 0.0)
    out = bn_train(conv1d(out, w2, b2), g2, be2)
    if shortcut:
        out = out + x_ncl
    return jnp.maximum(out, 0.0)


if __name__ == "__main__":
    # small shapes: batch=4, input_dim=n_filters=16, sequence length=256
    B, C_IN, N_FILT, L = 4, 16, 16, 256
    key = jax.random.PRNGKey(0)
    ks = jax.random.split(key, 7)

    x = jax.random.normal(ks[0], (B, C_IN, L), jnp.float32)

    # deterministic synthetic parameters (PyTorch Conv1d weight: (Cout, Cin, K))
    w1 = 0.2 * jax.random.normal(ks[1], (N_FILT, C_IN, KSIZE), jnp.float32)
    b1 = 0.1 * jax.random.normal(ks[2], (N_FILT,), jnp.float32)
    w2 = 0.2 * jax.random.normal(ks[3], (N_FILT, N_FILT, KSIZE), jnp.float32)
    b2 = 0.1 * jax.random.normal(ks[4], (N_FILT,), jnp.float32)
    g1 = 1.0 + 0.1 * jax.random.normal(ks[5], (N_FILT,), jnp.float32)
    be1 = 0.05 * jax.random.normal(ks[6], (N_FILT,), jnp.float32)
    g2 = jnp.ones((N_FILT,), jnp.float32)     # BatchNorm1d default init
    be2 = jnp.zeros((N_FILT,), jnp.float32)

    params = (w1, b1, g1, be1, w2, b2, g2, be2)

    fwd = jax.jit(functools.partial(basic_conv_res_block, shortcut=True))
    out = jax.block_until_ready(fwd(x, params))

    ref = _ref_forward(x, params, shortcut=True)
    assert out.shape == (B, N_FILT, L)
    max_err = float(jnp.max(jnp.abs(out - ref)))
    # bf16 MXU feeds + bf16 h1 storage => looser tolerance than the f32 ref.
    assert jnp.allclose(out, ref, atol=1e-1, rtol=1e-1), f"max err {max_err}"

    print("KERNEL_OK")
</pallas_src>

<mosaic_0001>
module attributes {stable_mosaic.version = 11 : i64} {
  func.func @_conv1_kernel(%arg0: i32, %arg1: memref<2x16x256xf32, #tpu.memory_space<vmem>>, %arg2: memref<3x16x16xbf16, #tpu.memory_space<vmem>>, %arg3: memref<16x1xf32, #tpu.memory_space<vmem>>, %arg4: memref<2x16x256xbf16, #tpu.memory_space<vmem>>, %arg5: memref<2x16x2xf32, #tpu.memory_space<vmem>>) attributes {dimension_semantics = [#tpu.dimension_semantics<parallel>], iteration_bounds = array<i64: 2>, scalar_prefetch = 0 : i64, scratch_operands = 0 : i64, tpu.core_type = #tpu.core_type<tc>, window_params = [{transform_indices = @transform_0, window_bounds = array<i64: 2, 16, 256>}, {pipeline_mode = #tpu.pipeline_mode<synchronous>, transform_indices = @transform_1, window_bounds = array<i64: 3, 16, 16>}, {pipeline_mode = #tpu.pipeline_mode<synchronous>, transform_indices = @transform_2, window_bounds = array<i64: 16, 1>}, {transform_indices = @transform_3, window_bounds = array<i64: 2, 16, 256>}, {transform_indices = @transform_4, window_bounds = array<i64: 2, 16, 2>}]} {
    %0 = tpu.iota {dimensions = array<i32: 1>} : vector<16x256xi32>
    %c0_i32 = arith.constant 0 : i32
    %1 = vector.broadcast %c0_i32 : i32 to vector<16x256xi32>
    %2 = arith.cmpi eq, %0, %1 : vector<16x256xi32>
    %c255_i32 = arith.constant 255 : i32
    %3 = vector.broadcast %c255_i32 : i32 to vector<16x256xi32>
    %4 = arith.cmpi eq, %0, %3 : vector<16x256xi32>
    %c0 = arith.constant 0 : index
    %c0_0 = arith.constant 0 : index
    %c0_1 = arith.constant 0 : index
    %5 = vector.load %arg2[%c0, %c0_0, %c0_1] : memref<3x16x16xbf16, #tpu.memory_space<vmem>>, vector<1x16x16xbf16>
    %6 = vector.shape_cast %5 : vector<1x16x16xbf16> to vector<16x16xbf16>
    %c1 = arith.constant 1 : index
    %c0_2 = arith.constant 0 : index
    %c0_3 = arith.constant 0 : index
    %7 = vector.load %arg2[%c1, %c0_2, %c0_3] : memref<3x16x16xbf16, #tpu.memory_space<vmem>>, vector<1x16x16xbf16>
    %8 = vector.shape_cast %7 : vector<1x16x16xbf16> to vector<16x16xbf16>
    %c2 = arith.constant 2 : index
    %c0_4 = arith.constant 0 : index
    %c0_5 = arith.constant 0 : index
    %9 = vector.load %arg2[%c2, %c0_4, %c0_5] : memref<3x16x16xbf16, #tpu.memory_space<vmem>>, vector<1x16x16xbf16>
    %10 = vector.shape_cast %9 : vector<1x16x16xbf16> to vector<16x16xbf16>
    %c0_6 = arith.constant 0 : index
    %c0_7 = arith.constant 0 : index
    %11 = vector.load %arg3[%c0_6, %c0_7] : memref<16x1xf32, #tpu.memory_space<vmem>>, vector<16x1xf32>
    %c0_8 = arith.constant 0 : index
    %c0_9 = arith.constant 0 : index
    %c0_10 = arith.constant 0 : index
    %12 = vector.load %arg1[%c0_8, %c0_9, %c0_10] : memref<2x16x256xf32, #tpu.memory_space<vmem>>, vector<1x16x256xf32>
    %13 = vector.shape_cast %12 : vector<1x16x256xf32> to vector<16x256xf32>
    %c1_i32 = arith.constant 1 : i32
    %14 = tpu.dynamic_rotate %13 by %c1_i32 dim 1 : vector<16x256xf32>, i32 -> vector<16x256xf32>
    %cst = arith.constant 0.000000e+00 : f32
    %15 = vector.broadcast %cst : f32 to vector<16x256xf32>
    %16 = arith.select %2, %15, %14 : vector<16x256xi1>, vector<16x256xf32>
    %c255_i32_11 = arith.constant 255 : i32
    %17 = tpu.dynamic_rotate %13 by %c255_i32_11 dim 1 : vector<16x256xf32>, i32 -> vector<16x256xf32>
    %cst_12 = arith.constant 0.000000e+00 : f32
    %18 = vector.broadcast %cst_12 : f32 to vector<16x256xf32>
    %19 = arith.select %4, %18, %17 : vector<16x256xi1>, vector<16x256xf32>
    %20 = arith.truncf %16 : vector<16x256xf32> to vector<16x256xbf16>
    %cst_13 = arith.constant dense<0.000000e+00> : vector<16x256xf32>
    %21 = tpu.matmul %6, %20, %cst_13 {dimension_numbers = #tpu.dot_dimension_numbers<[1], [0], [0], [1], [0, 0, 1, 1], [], []>} : vector<16x16xbf16>, vector<16x256xbf16>, vector<16x256xf32> -> vector<16x256xf32>
    %22 = arith.truncf %13 : vector<16x256xf32> to vector<16x256xbf16>
    %cst_14 = arith.constant dense<0.000000e+00> : vector<16x256xf32>
    %23 = tpu.matmul %8, %22, %cst_14 {dimension_numbers = #tpu.dot_dimension_numbers<[1], [0], [0], [1], [0, 0, 1, 1], [], []>} : vector<16x16xbf16>, vector<16x256xbf16>, vector<16x256xf32> -> vector<16x256xf32>
    %24 = arith.addf %21, %23 : vector<16x256xf32>
    %25 = arith.truncf %19 : vector<16x256xf32> to vector<16x256xbf16>
    %cst_15 = arith.constant dense<0.000000e+00> : vector<16x256xf32>
    %26 = tpu.matmul %10, %25, %cst_15 {dimension_numbers = #tpu.dot_dimension_numbers<[1], [0], [0], [1], [0, 0, 1, 1], [], []>} : vector<16x16xbf16>, vector<16x256xbf16>, vector<16x256xf32> -> vector<16x256xf32>
    %27 = arith.addf %24, %26 : vector<16x256xf32>
    %28 = vector.broadcast %11 : vector<16x1xf32> to vector<16x256xf32>
    %29 = arith.addf %27, %28 : vector<16x256xf32>
    %30 = arith.truncf %29 : vector<16x256xf32> to vector<16x256xbf16>
    %c0_16 = arith.constant 0 : index
    %c0_17 = arith.constant 0 : index
    %c0_18 = arith.constant 0 : index
    %31 = vector.load %arg4[%c0_16, %c0_17, %c0_18] : memref<2x16x256xbf16, #tpu.memory_space<vmem>>, vector<1x16x256xbf16>
    %32 = vector.shape_cast %31 : vector<1x16x256xbf16> to vector<16x256xbf16>
    %33 = vector.shape_cast %30 : vector<16x256xbf16> to vector<1x16x256xbf16>
    tpu.vector_store %arg4[%c0_16, %c0_17, %c0_18], %33 {strides = array<i32>} : memref<2x16x256xbf16, #tpu.memory_space<vmem>>, vector<1x16x256xbf16>,
    %34 = arith.extf %30 : vector<16x256xbf16> to vector<16x256xf32>
    %cst_19 = arith.constant dense<0.000000e+00> : vector<16xf32>
    %35 = vector.multi_reduction <add>, %34, %cst_19 [1] : vector<16x256xf32> to vector<16xf32>
    %36 = vector.shape_cast %35 : vector<16xf32> to vector<16x1xf32>
    %cst_20 = arith.constant 3.906250e-03 : f32
    %37 = vector.broadcast %cst_20 : f32 to vector<16x1xf32>
    %38 = arith.mulf %36, %37 : vector<16x1xf32>
    %39 = vector.broadcast %38 : vector<16x1xf32> to vector<16x256xf32>
    %40 = arith.subf %34, %39 : vector<16x256xf32>
    %41 = arith.mulf %40, %40 : vector<16x256xf32>
    %cst_21 = arith.constant dense<0.000000e+00> : vector<16xf32>
    %42 = vector.multi_reduction <add>, %41, %cst_21 [1] : vector<16x256xf32> to vector<16xf32>
    %43 = vector.shape_cast %42 : vector<16xf32> to vector<16x1xf32>
    %44 = tpu.concatenate %36, %43 in 1 : vector<16x1xf32>, vector<16x1xf32> -> vector<16x2xf32>
    %c0_22 = arith.constant 0 : index
    %c0_23 = arith.constant 0 : index
    %c0_24 = arith.constant 0 : index
    %45 = vector.load %arg5[%c0_22, %c0_23, %c0_24] : memref<2x16x2xf32, #tpu.memory_space<vmem>>, vector<1x16x2xf32>
    %46 = vector.shape_cast %45 : vector<1x16x2xf32> to vector<16x2xf32>
    %47 = vector.shape_cast %44 : vector<16x2xf32> to vector<1x16x2xf32>
    tpu.vector_store %arg5[%c0_22, %c0_23, %c0_24], %47 {strides = array<i32>} : memref<2x16x2xf32, #tpu.memory_space<vmem>>, vector<1x16x2xf32>,
    %c1_25 = arith.constant 1 : index
    %c0_26 = arith.constant 0 : index
    %c0_27 = arith.constant 0 : index
    %48 = vector.load %arg1[%c1_25, %c0_26, %c0_27] : memref<2x16x256xf32, #tpu.memory_space<vmem>>, vector<1x16x256xf32>
    %49 = vector.shape_cast %48 : vector<1x16x256xf32> to vector<16x256xf32>
    %c1_i32_28 = arith.constant 1 : i32
    %50 = tpu.dynamic_rotate %49 by %c1_i32_28 dim 1 : vector<16x256xf32>, i32 -> vector<16x256xf32>
    %cst_29 = arith.constant 0.000000e+00 : f32
    %51 = vector.broadcast %cst_29 : f32 to vector<16x256xf32>
    %52 = arith.select %2, %51, %50 : vector<16x256xi1>, vector<16x256xf32>
    %c255_i32_30 = arith.constant 255 : i32
    %53 = tpu.dynamic_rotate %49 by %c255_i32_30 dim 1 : vector<16x256xf32>, i32 -> vector<16x256xf32>
    %cst_31 = arith.constant 0.000000e+00 : f32
    %54 = vector.broadcast %cst_31 : f32 to vector<16x256xf32>
    %55 = arith.select %4, %54, %53 : vector<16x256xi1>, vector<16x256xf32>
    %56 = arith.truncf %52 : vector<16x256xf32> to vector<16x256xbf16>
    %cst_32 = arith.constant dense<0.000000e+00> : vector<16x256xf32>
    %57 = tpu.matmul %6, %56, %cst_32 {dimension_numbers = #tpu.dot_dimension_numbers<[1], [0], [0], [1], [0, 0, 1, 1], [], []>} : vector<16x16xbf16>, vector<16x256xbf16>, vector<16x256xf32> -> vector<16x256xf32>
    %58 = arith.truncf %49 : vector<16x256xf32> to vector<16x256xbf16>
    %cst_33 = arith.constant dense<0.000000e+00> : vector<16x256xf32>
    %59 = tpu.matmul %8, %58, %cst_33 {dimension_numbers = #tpu.dot_dimension_numbers<[1], [0], [0], [1], [0, 0, 1, 1], [], []>} : vector<16x16xbf16>, vector<16x256xbf16>, vector<16x256xf32> -> vector<16x256xf32>
    %60 = arith.addf %57, %59 : vector<16x256xf32>
    %61 = arith.truncf %55 : vector<16x256xf32> to vector<16x256xbf16>
    %cst_34 = arith.constant dense<0.000000e+00> : vector<16x256xf32>
    %62 = tpu.matmul %10, %61, %cst_34 {dimension_numbers = #tpu.dot_dimension_numbers<[1], [0], [0], [1], [0, 0, 1, 1], [], []>} : vector<16x16xbf16>, vector<16x256xbf16>, vector<16x256xf32> -> vector<16x256xf32>
    %63 = arith.addf %60, %62 : vector<16x256xf32>
    %64 = vector.broadcast %11 : vector<16x1xf32> to vector<16x256xf32>
    %65 = arith.addf %63, %64 : vector<16x256xf32>
    %66 = arith.truncf %65 : vector<16x256xf32> to vector<16x256xbf16>
    %c1_35 = arith.constant 1 : index
    %c0_36 = arith.constant 0 : index
    %c0_37 = arith.constant 0 : index
    %67 = vector.load %arg4[%c1_35, %c0_36, %c0_37] : memref<2x16x256xbf16, #tpu.memory_space<vmem>>, vector<1x16x256xbf16>
    %68 = vector.shape_cast %67 : vector<1x16x256xbf16> to vector<16x256xbf16>
    %69 = vector.shape_cast %66 : vector<16x256xbf16> to vector<1x16x256xbf16>
    tpu.vector_store %arg4[%c1_35, %c0_36, %c0_37], %69 {strides = array<i32>} : memref<2x16x256xbf16, #tpu.memory_space<vmem>>, vector<1x16x256xbf16>,
    %70 = arith.extf %66 : vector<16x256xbf16> to vector<16x256xf32>
    %cst_38 = arith.constant dense<0.000000e+00> : vector<16xf32>
    %71 = vector.multi_reduction <add>, %70, %cst_38 [1] : vector<16x256xf32> to vector<16xf32>
    %72 = vector.shape_cast %71 : vector<16xf32> to vector<16x1xf32>
    %cst_39 = arith.constant 3.906250e-03 : f32
    %73 = vector.broadcast %cst_39 : f32 to vector<16x1xf32>
    %74 = arith.mulf %72, %73 : vector<16x1xf32>
    %75 = vector.broadcast %74 : vector<16x1xf32> to vector<16x256xf32>
    %76 = arith.subf %70, %75 : vector<16x256xf32>
    %77 = arith.mulf %76, %76 : vector<16x256xf32>
    %cst_40 = arith.constant dense<0.000000e+00> : vector<16xf32>
    %78 = vector.multi_reduction <add>, %77, %cst_40 [1] : vector<16x256xf32> to vector<16xf32>
    %79 = vector.shape_cast %78 : vector<16xf32> to vector<16x1xf32>
    %80 = tpu.concatenate %72, %79 in 1 : vector<16x1xf32>, vector<16x1xf32> -> vector<16x2xf32>
    %c1_41 = arith.constant 1 : index
    %c0_42 = arith.constant 0 : index
    %c0_43 = arith.constant 0 : index
    %81 = vector.load %arg5[%c1_41, %c0_42, %c0_43] : memref<2x16x2xf32, #tpu.memory_space<vmem>>, vector<1x16x2xf32>
    %82 = vector.shape_cast %81 : vector<1x16x2xf32> to vector<16x2xf32>
    %83 = vector.shape_cast %80 : vector<16x2xf32> to vector<1x16x2xf32>
    tpu.vector_store %arg5[%c1_41, %c0_42, %c0_43], %83 {strides = array<i32>} : memref<2x16x2xf32, #tpu.memory_space<vmem>>, vector<1x16x2xf32>,
    return
  }
  func.func @transform_0(%arg0: i32) -> (i32, i32, i32) {
    %c0_i32 = arith.constant 0 : i32
    %c0_i32_0 = arith.constant 0 : i32
    %c0_i32_1 = arith.constant 0 : i32
    return %arg0, %c0_i32, %c0_i32_0 : i32, i32, i32
  }
  func.func @transform_1(%arg0: i32) -> (i32, i32, i32) {
    %c0_i32 = arith.constant 0 : i32
    %c0_i32_0 = arith.constant 0 : i32
    %c0_i32_1 = arith.constant 0 : i32
    %c0_i32_2 = arith.constant 0 : i32
    return %c0_i32, %c0_i32_0, %c0_i32_1 : i32, i32, i32
  }
  func.func @transform_2(%arg0: i32) -> (i32, i32) {
    %c0_i32 = arith.constant 0 : i32
    %c0_i32_0 = arith.constant 0 : i32
    %c0_i32_1 = arith.constant 0 : i32
    return %c0_i32, %c0_i32_0 : i32, i32
  }
  func.func @transform_3(%arg0: i32) -> (i32, i32, i32) {
    %c0_i32 = arith.constant 0 : i32
    %c0_i32_0 = arith.constant 0 : i32
    %c0_i32_1 = arith.constant 0 : i32
    return %arg0, %c0_i32, %c0_i32_0 : i32, i32, i32
  }
  func.func @transform_4(%arg0: i32) -> (i32, i32, i32) {
    %c0_i32 = arith.constant 0 : i32
    %c0_i32_0 = arith.constant 0 : i32
    %c0_i32_1 = arith.constant 0 : i32
    return %arg0, %c0_i32, %c0_i32_0 : i32, i32, i32
  }
}

module attributes {stable_mosaic.version = 11 : i64} {
  func.func @_bn1_relu_conv2_stats_kernel(%arg0: i32, %arg1: memref<2x16x256xbf16, #tpu.memory_space<vmem>>, %arg2: memref<16x1xf32, #tpu.memory_space<vmem>>, %arg3: memref<16x1xf32, #tpu.memory_space<vmem>>, %arg4: memref<3x16x16xbf16, #tpu.memory_space<vmem>>, %arg5: memref<16x1xf32, #tpu.memory_space<vmem>>, %arg6: memref<2x16x2xf32, #tpu.memory_space<vmem>>) attributes {dimension_semantics = [#tpu.dimension_semantics<parallel>], iteration_bounds = array<i64: 2>, scalar_prefetch = 0 : i64, scratch_operands = 0 : i64, tpu.core_type = #tpu.core_type<tc>, window_params = [{transform_indices = @transform_0, window_bounds = array<i64: 2, 16, 256>}, {pipeline_mode = #tpu.pipeline_mode<synchronous>, transform_indices = @transform_1, window_bounds = array<i64: 16, 1>}, {pipeline_mode = #tpu.pipeline_mode<synchronous>, transform_indices = @transform_2, window_bounds = array<i64: 16, 1>}, {pipeline_mode = #tpu.pipeline_mode<synchronous>, transform_indices = @transform_3, window_bounds = array<i64: 3, 16, 16>}, {pipeline_mode = #tpu.pipeline_mode<synchronous>, transform_indices = @transform_4, window_bounds = array<i64: 16, 1>}, {transform_indices = @transform_5, window_bounds = array<i64: 2, 16, 2>}]} {
    %0 = tpu.iota {dimensions = array<i32: 1>} : vector<16x256xi32>
    %c0_i32 = arith.constant 0 : i32
    %1 = vector.broadcast %c0_i32 : i32 to vector<16x256xi32>
    %2 = arith.cmpi eq, %0, %1 : vector<16x256xi32>
    %c255_i32 = arith.constant 255 : i32
    %3 = vector.broadcast %c255_i32 : i32 to vector<16x256xi32>
    %4 = arith.cmpi eq, %0, %3 : vector<16x256xi32>
    %c0 = arith.constant 0 : index
    %c0_0 = arith.constant 0 : index
    %c0_1 = arith.constant 0 : index
    %5 = vector.load %arg4[%c0, %c0_0, %c0_1] : memref<3x16x16xbf16, #tpu.memory_space<vmem>>, vector<1x16x16xbf16>
    %6 = vector.shape_cast %5 : vector<1x16x16xbf16> to vector<16x16xbf16>
    %c1 = arith.constant 1 : index
    %c0_2 = arith.constant 0 : index
    %c0_3 = arith.constant 0 : index
    %7 = vector.load %arg4[%c1, %c0_2, %c0_3] : memref<3x16x16xbf16, #tpu.memory_space<vmem>>, vector<1x16x16xbf16>
    %8 = vector.shape_cast %7 : vector<1x16x16xbf16> to vector<16x16xbf16>
    %c2 = arith.constant 2 : index
    %c0_4 = arith.constant 0 : index
    %c0_5 = arith.constant 0 : index
    %9 = vector.load %arg4[%c2, %c0_4, %c0_5] : memref<3x16x16xbf16, #tpu.memory_space<vmem>>, vector<1x16x16xbf16>
    %10 = vector.shape_cast %9 : vector<1x16x16xbf16> to vector<16x16xbf16>
    %c0_6 = arith.constant 0 : index
    %c0_7 = arith.constant 0 : index
    %11 = vector.load %arg5[%c0_6, %c0_7] : memref<16x1xf32, #tpu.memory_space<vmem>>, vector<16x1xf32>
    %c0_8 = arith.constant 0 : index
    %c0_9 = arith.constant 0 : index
    %12 = vector.load %arg2[%c0_8, %c0_9] : memref<16x1xf32, #tpu.memory_space<vmem>>, vector<16x1xf32>
    %c0_10 = arith.constant 0 : index
    %c0_11 = arith.constant 0 : index
    %13 = vector.load %arg3[%c0_10, %c0_11] : memref<16x1xf32, #tpu.memory_space<vmem>>, vector<16x1xf32>
    %c0_12 = arith.constant 0 : index
    %c0_13 = arith.constant 0 : index
    %c0_14 = arith.constant 0 : index
    %14 = vector.load %arg1[%c0_12, %c0_13, %c0_14] : memref<2x16x256xbf16, #tpu.memory_space<vmem>>, vector<1x16x256xbf16>
    %15 = vector.shape_cast %14 : vector<1x16x256xbf16> to vector<16x256xbf16>
    %16 = arith.extf %15 : vector<16x256xbf16> to vector<16x256xf32>
    %17 = vector.broadcast %12 : vector<16x1xf32> to vector<16x256xf32>
    %18 = arith.mulf %17, %16 : vector<16x256xf32>
    %19 = vector.broadcast %13 : vector<16x1xf32> to vector<16x256xf32>
    %20 = arith.addf %18, %19 : vector<16x256xf32>
    %cst = arith.constant 0.000000e+00 : f32
    %21 = vector.broadcast %cst : f32 to vector<16x256xf32>
    %22 = arith.maximumf %20, %21 : vector<16x256xf32>
    %c1_i32 = arith.constant 1 : i32
    %23 = tpu.dynamic_rotate %22 by %c1_i32 dim 1 : vector<16x256xf32>, i32 -> vector<16x256xf32>
    %cst_15 = arith.constant 0.000000e+00 : f32
    %24 = vector.broadcast %cst_15 : f32 to vector<16x256xf32>
    %25 = arith.select %2, %24, %23 : vector<16x256xi1>, vector<16x256xf32>
    %c255_i32_16 = arith.constant 255 : i32
    %26 = tpu.dynamic_rotate %22 by %c255_i32_16 dim 1 : vector<16x256xf32>, i32 -> vector<16x256xf32>
    %cst_17 = arith.constant 0.000000e+00 : f32
    %27 = vector.broadcast %cst_17 : f32 to vector<16x256xf32>
    %28 = arith.select %4, %27, %26 : vector<16x256xi1>, vector<16x256xf32>
    %29 = arith.truncf %25 : vector<16x256xf32> to vector<16x256xbf16>
    %cst_18 = arith.constant dense<0.000000e+00> : vector<16x256xf32>
    %30 = tpu.matmul %6, %29, %cst_18 {dimension_numbers = #tpu.dot_dimension_numbers<[1], [0], [0], [1], [0, 0, 1, 1], [], []>} : vector<16x16xbf16>, vector<16x256xbf16>, vector<16x256xf32> -> vector<16x256xf32>
    %31 = arith.truncf %22 : vector<16x256xf32> to vector<16x256xbf16>
    %cst_19 = arith.constant dense<0.000000e+00> : vector<16x256xf32>
    %32 = tpu.matmul %8, %31, %cst_19 {dimension_numbers = #tpu.dot_dimension_numbers<[1], [0], [0], [1], [0, 0, 1, 1], [], []>} : vector<16x16xbf16>, vector<16x256xbf16>, vector<16x256xf32> -> vector<16x256xf32>
    %33 = arith.addf %30, %32 : vector<16x256xf32>
    %34 = arith.truncf %28 : vector<16x256xf32> to vector<16x256xbf16>
    %cst_20 = arith.constant dense<0.000000e+00> : vector<16x256xf32>
    %35 = tpu.matmul %10, %34, %cst_20 {dimension_numbers = #tpu.dot_dimension_numbers<[1], [0], [0], [1], [0, 0, 1, 1], [], []>} : vector<16x16xbf16>, vector<16x256xbf16>, vector<16x256xf32> -> vector<16x256xf32>
    %36 = arith.addf %33, %35 : vector<16x256xf32>
    %37 = vector.broadcast %11 : vector<16x1xf32> to vector<16x256xf32>
    %38 = arith.addf %36, %37 : vector<16x256xf32>
    %cst_21 = arith.constant dense<0.000000e+00> : vector<16xf32>
    %39 = vector.multi_reduction <add>, %38, %cst_21 [1] : vector<16x256xf32> to vector<16xf32>
    %40 = vector.shape_cast %39 : vector<16xf32> to vector<16x1xf32>
    %cst_22 = arith.constant 3.906250e-03 : f32
    %41 = vector.broadcast %cst_22 : f32 to vector<16x1xf32>
    %42 = arith.mulf %40, %41 : vector<16x1xf32>
    %43 = vector.broadcast %42 : vector<16x1xf32> to vector<16x256xf32>
    %44 = arith.subf %38, %43 : vector<16x256xf32>
    %45 = arith.mulf %44, %44 : vector<16x256xf32>
    %cst_23 = arith.constant dense<0.000000e+00> : vector<16xf32>
    %46 = vector.multi_reduction <add>, %45, %cst_23 [1] : vector<16x256xf32> to vector<16xf32>
    %47 = vector.shape_cast %46 : vector<16xf32> to vector<16x1xf32>
    %48 = tpu.concatenate %40, %47 in 1 : vector<16x1xf32>, vector<16x1xf32> -> vector<16x2xf32>
    %c0_24 = arith.constant 0 : index
    %c0_25 = arith.constant 0 : index
    %c0_26 = arith.constant 0 : index
    %49 = vector.load %arg6[%c0_24, %c0_25, %c0_26] : memref<2x16x2xf32, #tpu.memory_space<vmem>>, vector<1x16x2xf32>
    %50 = vector.shape_cast %49 : vector<1x16x2xf32> to vector<16x2xf32>
    %51 = vector.shape_cast %48 : vector<16x2xf32> to vector<1x16x2xf32>
    tpu.vector_store %arg6[%c0_24, %c0_25, %c0_26], %51 {strides = array<i32>} : memref<2x16x2xf32, #tpu.memory_space<vmem>>, vector<1x16x2xf32>,
    %c1_27 = arith.constant 1 : index
    %c0_28 = arith.constant 0 : index
    %c0_29 = arith.constant 0 : index
    %52 = vector.load %arg1[%c1_27, %c0_28, %c0_29] : memref<2x16x256xbf16, #tpu.memory_space<vmem>>, vector<1x16x256xbf16>
    %53 = vector.shape_cast %52 : vector<1x16x256xbf16> to vector<16x256xbf16>
    %54 = arith.extf %53 : vector<16x256xbf16> to vector<16x256xf32>
    %55 = vector.broadcast %12 : vector<16x1xf32> to vector<16x256xf32>
    %56 = arith.mulf %55, %54 : vector<16x256xf32>
    %57 = vector.broadcast %13 : vector<16x1xf32> to vector<16x256xf32>
    %58 = arith.addf %56, %57 : vector<16x256xf32>
    %cst_30 = arith.constant 0.000000e+00 : f32
    %59 = vector.broadcast %cst_30 : f32 to vector<16x256xf32>
    %60 = arith.maximumf %58, %59 : vector<16x256xf32>
    %c1_i32_31 = arith.constant 1 : i32
    %61 = tpu.dynamic_rotate %60 by %c1_i32_31 dim 1 : vector<16x256xf32>, i32 -> vector<16x256xf32>
    %cst_32 = arith.constant 0.000000e+00 : f32
    %62 = vector.broadcast %cst_32 : f32 to vector<16x256xf32>
    %63 = arith.select %2, %62, %61 : vector<16x256xi1>, vector<16x256xf32>
    %c255_i32_33 = arith.constant 255 : i32
    %64 = tpu.dynamic_rotate %60 by %c255_i32_33 dim 1 : vector<16x256xf32>, i32 -> vector<16x256xf32>
    %cst_34 = arith.constant 0.000000e+00 : f32
    %65 = vector.broadcast %cst_34 : f32 to vector<16x256xf32>
    %66 = arith.select %4, %65, %64 : vector<16x256xi1>, vector<16x256xf32>
    %67 = arith.truncf %63 : vector<16x256xf32> to vector<16x256xbf16>
    %cst_35 = arith.constant dense<0.000000e+00> : vector<16x256xf32>
    %68 = tpu.matmul %6, %67, %cst_35 {dimension_numbers = #tpu.dot_dimension_numbers<[1], [0], [0], [1], [0, 0, 1, 1], [], []>} : vector<16x16xbf16>, vector<16x256xbf16>, vector<16x256xf32> -> vector<16x256xf32>
    %69 = arith.truncf %60 : vector<16x256xf32> to vector<16x256xbf16>
    %cst_36 = arith.constant dense<0.000000e+00> : vector<16x256xf32>
    %70 = tpu.matmul %8, %69, %cst_36 {dimension_numbers = #tpu.dot_dimension_numbers<[1], [0], [0], [1], [0, 0, 1, 1], [], []>} : vector<16x16xbf16>, vector<16x256xbf16>, vector<16x256xf32> -> vector<16x256xf32>
    %71 = arith.addf %68, %70 : vector<16x256xf32>
    %72 = arith.truncf %66 : vector<16x256xf32> to vector<16x256xbf16>
    %cst_37 = arith.constant dense<0.000000e+00> : vector<16x256xf32>
    %73 = tpu.matmul %10, %72, %cst_37 {dimension_numbers = #tpu.dot_dimension_numbers<[1], [0], [0], [1], [0, 0, 1, 1], [], []>} : vector<16x16xbf16>, vector<16x256xbf16>, vector<16x256xf32> -> vector<16x256xf32>
    %74 = arith.addf %71, %73 : vector<16x256xf32>
    %75 = vector.broadcast %11 : vector<16x1xf32> to vector<16x256xf32>
    %76 = arith.addf %74, %75 : vector<16x256xf32>
    %cst_38 = arith.constant dense<0.000000e+00> : vector<16xf32>
    %77 = vector.multi_reduction <add>, %76, %cst_38 [1] : vector<16x256xf32> to vector<16xf32>
    %78 = vector.shape_cast %77 : vector<16xf32> to vector<16x1xf32>
    %cst_39 = arith.constant 3.906250e-03 : f32
    %79 = vector.broadcast %cst_39 : f32 to vector<16x1xf32>
    %80 = arith.mulf %78, %79 : vector<16x1xf32>
    %81 = vector.broadcast %80 : vector<16x1xf32> to vector<16x256xf32>
    %82 = arith.subf %76, %81 : vector<16x256xf32>
    %83 = arith.mulf %82, %82 : vector<16x256xf32>
    %cst_40 = arith.constant dense<0.000000e+00> : vector<16xf32>
    %84 = vector.multi_reduction <add>, %83, %cst_40 [1] : vector<16x256xf32> to vector<16xf32>
    %85 = vector.shape_cast %84 : vector<16xf32> to vector<16x1xf32>
    %86 = tpu.concatenate %78, %85 in 1 : vector<16x1xf32>, vector<16x1xf32> -> vector<16x2xf32>
    %c1_41 = arith.constant 1 : index
    %c0_42 = arith.constant 0 : index
    %c0_43 = arith.constant 0 : index
    %87 = vector.load %arg6[%c1_41, %c0_42, %c0_43] : memref<2x16x2xf32, #tpu.memory_space<vmem>>, vector<1x16x2xf32>
    %88 = vector.shape_cast %87 : vector<1x16x2xf32> to vector<16x2xf32>
    %89 = vector.shape_cast %86 : vector<16x2xf32> to vector<1x16x2xf32>
    tpu.vector_store %arg6[%c1_41, %c0_42, %c0_43], %89 {strides = array<i32>} : memref<2x16x2xf32, #tpu.memory_space<vmem>>, vector<1x16x2xf32>,
    return
  }
  func.func @transform_0(%arg0: i32) -> (i32, i32, i32) {
    %c0_i32 = arith.constant 0 : i32
    %c0_i32_0 = arith.constant 0 : i32
    %c0_i32_1 = arith.constant 0 : i32
    return %arg0, %c0_i32, %c0_i32_0 : i32, i32, i32
  }
  func.func @transform_1(%arg0: i32) -> (i32, i32) {
    %c0_i32 = arith.constant 0 : i32
    %c0_i32_0 = arith.constant 0 : i32
    %c0_i32_1 = arith.constant 0 : i32
    return %c0_i32, %c0_i32_0 : i32, i32
  }
  func.func @transform_2(%arg0: i32) -> (i32, i32) {
    %c0_i32 = arith.constant 0 : i32
    %c0_i32_0 = arith.constant 0 : i32
    %c0_i32_1 = arith.constant 0 : i32
    return %c0_i32, %c0_i32_0 : i32, i32
  }
  func.func @transform_3(%arg0: i32) -> (i32, i32, i32) {
    %c0_i32 = arith.constant 0 : i32
    %c0_i32_0 = arith.constant 0 : i32
    %c0_i32_1 = arith.constant 0 : i32
    %c0_i32_2 = arith.constant 0 : i32
    return %c0_i32, %c0_i32_0, %c0_i32_1 : i32, i32, i32
  }
  func.func @transform_4(%arg0: i32) -> (i32, i32) {
    %c0_i32 = arith.constant 0 : i32
    %c0_i32_0 = arith.constant 0 : i32
    %c0_i32_1 = arith.constant 0 : i32
    return %c0_i32, %c0_i32_0 : i32, i32
  }
  func.func @transform_5(%arg0: i32) -> (i32, i32, i32) {
    %c0_i32 = arith.constant 0 : i32
    %c0_i32_0 = arith.constant 0 : i32
    %c0_i32_1 = arith.constant 0 : i32
    return %arg0, %c0_i32, %c0_i32_0 : i32, i32, i32
  }
}

module attributes {stable_mosaic.version = 11 : i64} {
  func.func @_bn1_relu_conv2_bn2_res_relu_kernel(%arg0: i32, %arg1: memref<2x16x256xbf16, #tpu.memory_space<vmem>>, %arg2: memref<16x1xf32, #tpu.memory_space<vmem>>, %arg3: memref<16x1xf32, #tpu.memory_space<vmem>>, %arg4: memref<3x16x16xbf16, #tpu.memory_space<vmem>>, %arg5: memref<16x1xf32, #tpu.memory_space<vmem>>, %arg6: memref<16x1xf32, #tpu.memory_space<vmem>>, %arg7: memref<16x1xf32, #tpu.memory_space<vmem>>, %arg8: memref<2x16x256xf32, #tpu.memory_space<vmem>>, %arg9: memref<2x16x256xf32, #tpu.memory_space<vmem>>) attributes {dimension_semantics = [#tpu.dimension_semantics<parallel>], iteration_bounds = array<i64: 2>, scalar_prefetch = 0 : i64, scratch_operands = 0 : i64, tpu.core_type = #tpu.core_type<tc>, window_params = [{transform_indices = @transform_0, window_bounds = array<i64: 2, 16, 256>}, {pipeline_mode = #tpu.pipeline_mode<synchronous>, transform_indices = @transform_1, window_bounds = array<i64: 16, 1>}, {pipeline_mode = #tpu.pipeline_mode<synchronous>, transform_indices = @transform_2, window_bounds = array<i64: 16, 1>}, {pipeline_mode = #tpu.pipeline_mode<synchronous>, transform_indices = @transform_3, window_bounds = array<i64: 3, 16, 16>}, {pipeline_mode = #tpu.pipeline_mode<synchronous>, transform_indices = @transform_4, window_bounds = array<i64: 16, 1>}, {pipeline_mode = #tpu.pipeline_mode<synchronous>, transform_indices = @transform_5, window_bounds = array<i64: 16, 1>}, {pipeline_mode = #tpu.pipeline_mode<synchronous>, transform_indices = @transform_6, window_bounds = array<i64: 16, 1>}, {transform_indices = @transform_7, window_bounds = array<i64: 2, 16, 256>}, {transform_indices = @transform_8, window_bounds = array<i64: 2, 16, 256>}]} {
    %0 = tpu.iota {dimensions = array<i32: 1>} : vector<16x256xi32>
    %c0_i32 = arith.constant 0 : i32
    %1 = vector.broadcast %c0_i32 : i32 to vector<16x256xi32>
    %2 = arith.cmpi eq, %0, %1 : vector<16x256xi32>
    %c255_i32 = arith.constant 255 : i32
    %3 = vector.broadcast %c255_i32 : i32 to vector<16x256xi32>
    %4 = arith.cmpi eq, %0, %3 : vector<16x256xi32>
    %c0 = arith.constant 0 : index
    %c0_0 = arith.constant 0 : index
    %c0_1 = arith.constant 0 : index
    %5 = vector.load %arg4[%c0, %c0_0, %c0_1] : memref<3x16x16xbf16, #tpu.memory_space<vmem>>, vector<1x16x16xbf16>
    %6 = vector.shape_cast %5 : vector<1x16x16xbf16> to vector<16x16xbf16>
    %c1 = arith.constant 1 : index
    %c0_2 = arith.constant 0 : index
    %c0_3 = arith.constant 0 : index
    %7 = vector.load %arg4[%c1, %c0_2, %c0_3] : memref<3x16x16xbf16, #tpu.memory_space<vmem>>, vector<1x16x16xbf16>
    %8 = vector.shape_cast %7 : vector<1x16x16xbf16> to vector<16x16xbf16>
    %c2 = arith.constant 2 : index
    %c0_4 = arith.constant 0 : index
    %c0_5 = arith.constant 0 : index
    %9 = vector.load %arg4[%c2, %c0_4, %c0_5] : memref<3x16x16xbf16, #tpu.memory_space<vmem>>, vector<1x16x16xbf16>
    %10 = vector.shape_cast %9 : vector<1x16x16xbf16> to vector<16x16xbf16>
    %c0_6 = arith.constant 0 : index
    %c0_7 = arith.constant 0 : index
    %11 = vector.load %arg5[%c0_6, %c0_7] : memref<16x1xf32, #tpu.memory_space<vmem>>, vector<16x1xf32>
    %c0_8 = arith.constant 0 : index
    %c0_9 = arith.constant 0 : index
    %12 = vector.load %arg2[%c0_8, %c0_9] : memref<16x1xf32, #tpu.memory_space<vmem>>, vector<16x1xf32>
    %c0_10 = arith.constant 0 : index
    %c0_11 = arith.constant 0 : index
    %13 = vector.load %arg3[%c0_10, %c0_11] : memref<16x1xf32, #tpu.memory_space<vmem>>, vector<16x1xf32>
    %c0_12 = arith.constant 0 : index
    %c0_13 = arith.constant 0 : index
    %14 = vector.load %arg6[%c0_12, %c0_13] : memref<16x1xf32, #tpu.memory_space<vmem>>, vector<16x1xf32>
    %c0_14 = arith.constant 0 : index
    %c0_15 = arith.constant 0 : index
    %15 = vector.load %arg7[%c0_14, %c0_15] : memref<16x1xf32, #tpu.memory_space<vmem>>, vector<16x1xf32>
    %c0_16 = arith.constant 0 : index
    %c0_17 = arith.constant 0 : index
    %c0_18 = arith.constant 0 : index
    %16 = vector.load %arg1[%c0_16, %c0_17, %c0_18] : memref<2x16x256xbf16, #tpu.memory_space<vmem>>, vector<1x16x256xbf16>
    %17 = vector.shape_cast %16 : vector<1x16x256xbf16> to vector<16x256xbf16>
    %18 = arith.extf %17 : vector<16x256xbf16> to vector<16x256xf32>
    %19 = vector.broadcast %12 : vector<16x1xf32> to vector<16x256xf32>
    %20 = arith.mulf %19, %18 : vector<16x256xf32>
    %21 = vector.broadcast %13 : vector<16x1xf32> to vector<16x256xf32>
    %22 = arith.addf %20, %21 : vector<16x256xf32>
    %cst = arith.constant 0.000000e+00 : f32
    %23 = vector.broadcast %cst : f32 to vector<16x256xf32>
    %24 = arith.maximumf %22, %23 : vector<16x256xf32>
    %c1_i32 = arith.constant 1 : i32
    %25 = tpu.dynamic_rotate %24 by %c1_i32 dim 1 : vector<16x256xf32>, i32 -> vector<16x256xf32>
    %cst_19 = arith.constant 0.000000e+00 : f32
    %26 = vector.broadcast %cst_19 : f32 to vector<16x256xf32>
    %27 = arith.select %2, %26, %25 : vector<16x256xi1>, vector<16x256xf32>
    %c255_i32_20 = arith.constant 255 : i32
    %28 = tpu.dynamic_rotate %24 by %c255_i32_20 dim 1 : vector<16x256xf32>, i32 -> vector<16x256xf32>
    %cst_21 = arith.constant 0.000000e+00 : f32
    %29 = vector.broadcast %cst_21 : f32 to vector<16x256xf32>
    %30 = arith.select %4, %29, %28 : vector<16x256xi1>, vector<16x256xf32>
    %31 = arith.truncf %27 : vector<16x256xf32> to vector<16x256xbf16>
    %cst_22 = arith.constant dense<0.000000e+00> : vector<16x256xf32>
    %32 = tpu.matmul %6, %31, %cst_22 {dimension_numbers = #tpu.dot_dimension_numbers<[1], [0], [0], [1], [0, 0, 1, 1], [], []>} : vector<16x16xbf16>, vector<16x256xbf16>, vector<16x256xf32> -> vector<16x256xf32>
    %33 = arith.truncf %24 : vector<16x256xf32> to vector<16x256xbf16>
    %cst_23 = arith.constant dense<0.000000e+00> : vector<16x256xf32>
    %34 = tpu.matmul %8, %33, %cst_23 {dimension_numbers = #tpu.dot_dimension_numbers<[1], [0], [0], [1], [0, 0, 1, 1], [], []>} : vector<16x16xbf16>, vector<16x256xbf16>, vector<16x256xf32> -> vector<16x256xf32>
    %35 = arith.addf %32, %34 : vector<16x256xf32>
    %36 = arith.truncf %30 : vector<16x256xf32> to vector<16x256xbf16>
    %cst_24 = arith.constant dense<0.000000e+00> : vector<16x256xf32>
    %37 = tpu.matmul %10, %36, %cst_24 {dimension_numbers = #tpu.dot_dimension_numbers<[1], [0], [0], [1], [0, 0, 1, 1], [], []>} : vector<16x16xbf16>, vector<16x256xbf16>, vector<16x256xf32> -> vector<16x256xf32>
    %38 = arith.addf %35, %37 : vector<16x256xf32>
    %39 = vector.broadcast %11 : vector<16x1xf32> to vector<16x256xf32>
    %40 = arith.addf %38, %39 : vector<16x256xf32>
    %41 = vector.broadcast %14 : vector<16x1xf32> to vector<16x256xf32>
    %42 = arith.mulf %41, %40 : vector<16x256xf32>
    %43 = vector.broadcast %15 : vector<16x1xf32> to vector<16x256xf32>
    %44 = arith.addf %42, %43 : vector<16x256xf32>
    %c0_25 = arith.constant 0 : index
    %c0_26 = arith.constant 0 : index
    %c0_27 = arith.constant 0 : index
    %45 = vector.load %arg8[%c0_25, %c0_26, %c0_27] : memref<2x16x256xf32, #tpu.memory_space<vmem>>, vector<1x16x256xf32>
    %46 = vector.shape_cast %45 : vector<1x16x256xf32> to vector<16x256xf32>
    %47 = arith.addf %44, %46 : vector<16x256xf32>
    %cst_28 = arith.constant 0.000000e+00 : f32
    %48 = vector.broadcast %cst_28 : f32 to vector<16x256xf32>
    %49 = arith.maximumf %47, %48 : vector<16x256xf32>
    %c0_29 = arith.constant 0 : index
    %c0_30 = arith.constant 0 : index
    %c0_31 = arith.constant 0 : index
    %50 = vector.load %arg9[%c0_29, %c0_30, %c0_31] : memref<2x16x256xf32, #tpu.memory_space<vmem>>, vector<1x16x256xf32>
    %51 = vector.shape_cast %50 : vector<1x16x256xf32> to vector<16x256xf32>
    %52 = vector.shape_cast %49 : vector<16x256xf32> to vector<1x16x256xf32>
    tpu.vector_store %arg9[%c0_29, %c0_30, %c0_31], %52 {strides = array<i32>} : memref<2x16x256xf32, #tpu.memory_space<vmem>>, vector<1x16x256xf32>,
    %c1_32 = arith.constant 1 : index
    %c0_33 = arith.constant 0 : index
    %c0_34 = arith.constant 0 : index
    %53 = vector.load %arg1[%c1_32, %c0_33, %c0_34] : memref<2x16x256xbf16, #tpu.memory_space<vmem>>, vector<1x16x256xbf16>
    %54 = vector.shape_cast %53 : vector<1x16x256xbf16> to vector<16x256xbf16>
    %55 = arith.extf %54 : vector<16x256xbf16> to vector<16x256xf32>
    %56 = vector.broadcast %12 : vector<16x1xf32> to vector<16x256xf32>
    %57 = arith.mulf %56, %55 : vector<16x256xf32>
    %58 = vector.broadcast %13 : vector<16x1xf32> to vector<16x256xf32>
    %59 = arith.addf %57, %58 : vector<16x256xf32>
    %cst_35 = arith.constant 0.000000e+00 : f32
    %60 = vector.broadcast %cst_35 : f32 to vector<16x256xf32>
    %61 = arith.maximumf %59, %60 : vector<16x256xf32>
    %c1_i32_36 = arith.constant 1 : i32
    %62 = tpu.dynamic_rotate %61 by %c1_i32_36 dim 1 : vector<16x256xf32>, i32 -> vector<16x256xf32>
    %cst_37 = arith.constant 0.000000e+00 : f32
    %63 = vector.broadcast %cst_37 : f32 to vector<16x256xf32>
    %64 = arith.select %2, %63, %62 : vector<16x256xi1>, vector<16x256xf32>
    %c255_i32_38 = arith.constant 255 : i32
    %65 = tpu.dynamic_rotate %61 by %c255_i32_38 dim 1 : vector<16x256xf32>, i32 -> vector<16x256xf32>
    %cst_39 = arith.constant 0.000000e+00 : f32
    %66 = vector.broadcast %cst_39 : f32 to vector<16x256xf32>
    %67 = arith.select %4, %66, %65 : vector<16x256xi1>, vector<16x256xf32>
    %68 = arith.truncf %64 : vector<16x256xf32> to vector<16x256xbf16>
    %cst_40 = arith.constant dense<0.000000e+00> : vector<16x256xf32>
    %69 = tpu.matmul %6, %68, %cst_40 {dimension_numbers = #tpu.dot_dimension_numbers<[1], [0], [0], [1], [0, 0, 1, 1], [], []>} : vector<16x16xbf16>, vector<16x256xbf16>, vector<16x256xf32> -> vector<16x256xf32>
    %70 = arith.truncf %61 : vector<16x256xf32> to vector<16x256xbf16>
    %cst_41 = arith.constant dense<0.000000e+00> : vector<16x256xf32>
    %71 = tpu.matmul %8, %70, %cst_41 {dimension_numbers = #tpu.dot_dimension_numbers<[1], [0], [0], [1], [0, 0, 1, 1], [], []>} : vector<16x16xbf16>, vector<16x256xbf16>, vector<16x256xf32> -> vector<16x256xf32>
    %72 = arith.addf %69, %71 : vector<16x256xf32>
    %73 = arith.truncf %67 : vector<16x256xf32> to vector<16x256xbf16>
    %cst_42 = arith.constant dense<0.000000e+00> : vector<16x256xf32>
    %74 = tpu.matmul %10, %73, %cst_42 {dimension_numbers = #tpu.dot_dimension_numbers<[1], [0], [0], [1], [0, 0, 1, 1], [], []>} : vector<16x16xbf16>, vector<16x256xbf16>, vector<16x256xf32> -> vector<16x256xf32>
    %75 = arith.addf %72, %74 : vector<16x256xf32>
    %76 = vector.broadcast %11 : vector<16x1xf32> to vector<16x256xf32>
    %77 = arith.addf %75, %76 : vector<16x256xf32>
    %78 = vector.broadcast %14 : vector<16x1xf32> to vector<16x256xf32>
    %79 = arith.mulf %78, %77 : vector<16x256xf32>
    %80 = vector.broadcast %15 : vector<16x1xf32> to vector<16x256xf32>
    %81 = arith.addf %79, %80 : vector<16x256xf32>
    %c1_43 = arith.constant 1 : index
    %c0_44 = arith.constant 0 : index
    %c0_45 = arith.constant 0 : index
    %82 = vector.load %arg8[%c1_43, %c0_44, %c0_45] : memref<2x16x256xf32, #tpu.memory_space<vmem>>, vector<1x16x256xf32>
    %83 = vector.shape_cast %82 : vector<1x16x256xf32> to vector<16x256xf32>
    %84 = arith.addf %81, %83 : vector<16x256xf32>
    %cst_46 = arith.constant 0.000000e+00 : f32
    %85 = vector.broadcast %cst_46 : f32 to vector<16x256xf32>
    %86 = arith.maximumf %84, %85 : vector<16x256xf32>
    %c1_47 = arith.constant 1 : index
    %c0_48 = arith.constant 0 : index
    %c0_49 = arith.constant 0 : index
    %87 = vector.load %arg9[%c1_47, %c0_48, %c0_49] : memref<2x16x256xf32, #tpu.memory_space<vmem>>, vector<1x16x256xf32>
    %88 = vector.shape_cast %87 : vector<1x16x256xf32> to vector<16x256xf32>
    %89 = vector.shape_cast %86 : vector<16x256xf32> to vector<1x16x256xf32>
    tpu.vector_store %arg9[%c1_47, %c0_48, %c0_49], %89 {strides = array<i32>} : memref<2x16x256xf32, #tpu.memory_space<vmem>>, vector<1x16x256xf32>,
    return
  }
  func.func @transform_0(%arg0: i32) -> (i32, i32, i32) {
    %c0_i32 = arith.constant 0 : i32
    %c0_i32_0 = arith.constant 0 : i32
    %c0_i32_1 = arith.constant 0 : i32
    return %arg0, %c0_i32, %c0_i32_0 : i32, i32, i32
  }
  func.func @transform_1(%arg0: i32) -> (i32, i32) {
    %c0_i32 = arith.constant 0 : i32
    %c0_i32_0 = arith.constant 0 : i32
    %c0_i32_1 = arith.constant 0 : i32
    return %c0_i32, %c0_i32_0 : i32, i32
  }
  func.func @transform_2(%arg0: i32) -> (i32, i32) {
    %c0_i32 = arith.constant 0 : i32
    %c0_i32_0 = arith.constant 0 : i32
    %c0_i32_1 = arith.constant 0 : i32
    return %c0_i32, %c0_i32_0 : i32, i32
  }
  func.func @transform_3(%arg0: i32) -> (i32, i32, i32) {
    %c0_i32 = arith.constant 0 : i32
    %c0_i32_0 = arith.constant 0 : i32
    %c0_i32_1 = arith.constant 0 : i32
    %c0_i32_2 = arith.constant 0 : i32
    return %c0_i32, %c0_i32_0, %c0_i32_1 : i32, i32, i32
  }
  func.func @transform_4(%arg0: i32) -> (i32, i32) {
    %c0_i32 = arith.constant 0 : i32
    %c0_i32_0 = arith.constant 0 : i32
    %c0_i32_1 = arith.constant 0 : i32
    return %c0_i32, %c0_i32_0 : i32, i32
  }
  func.func @transform_5(%arg0: i32) -> (i32, i32) {
    %c0_i32 = arith.constant 0 : i32
    %c0_i32_0 = arith.constant 0 : i32
    %c0_i32_1 = arith.constant 0 : i32
    return %c0_i32, %c0_i32_0 : i32, i32
  }
  func.func @transform_6(%arg0: i32) -> (i32, i32) {
    %c0_i32 = arith.constant 0 : i32
    %c0_i32_0 = arith.constant 0 : i32
    %c0_i32_1 = arith.constant 0 : i32
    return %c0_i32, %c0_i32_0 : i32, i32
  }
  func.func @transform_7(%arg0: i32) -> (i32, i32, i32) {
    %c0_i32 = arith.constant 0 : i32
    %c0_i32_0 = arith.constant 0 : i32
    %c0_i32_1 = arith.constant 0 : i32
    return %arg0, %c0_i32, %c0_i32_0 : i32, i32, i32
  }
  func.func @transform_8(%arg0: i32) -> (i32, i32, i32) {
    %c0_i32 = arith.constant 0 : i32
    %c0_i32_0 = arith.constant 0 : i32
    %c0_i32_1 = arith.constant 0 : i32
    return %arg0, %c0_i32, %c0_i32_0 : i32, i32, i32
  }
}

</mosaic_0001>

<bundles_post_ra>
// kernel: basic_conv_res_block.3
= control target key start
LH: loop header
LB: loop body
LE: loop exit
PB: predicated region body
PF: predicated region fallthrough
CT: control target
= control target key end

     0   :  { %s984_s15 = smov 0   ;;  %s1130_s0 = inlined_call_operand.vmem [shape: f32[4,16,256], index: 0, kind: input, shape index: {}]   ;;  %s1131_s1 = inlined_call_operand.vmem [shape: bf16[3,16,16], index: 1, kind: input, shape index: {}]   ;;  %s1132_s2 = inlined_call_operand.vmem [shape: f32[16,1], index: 2, kind: input, shape index: {}]   ;;  %s1133_s3 = inlined_call_operand.vmem [shape: bf16[4,16,256], index: 3, kind: output, shape index: {0}]   ;;  %s1134_s4 = inlined_call_operand.vmem [shape: f32[4,16,2], index: 4, kind: output, shape index: {1}]  }
   0x1 LB: > { %s822_s16 = sadd.s32 4294967295, %s954_s15   ;;  %p826_p0 = scmp.ge.s32.totalorder %s954_s15, 1  ;;  %s954_s15 = sphi %s984_s15, %s15_s15  }
   0x2   : > { %p167_p1 = scmp.lt.s32.totalorder %s954_s15, 3 }
   0x4   : > { %p168_p2 = pnand %p826_p0, %p167_p1 }
   0x5   : > { %s827_s17 = sshll.u32 (!%p168_p2), %s822_s16, 1  ;;  %s957_s22 = smov (!%p168_p2), 127  }
   0x6   : > { %171 = sbr.rel (%p168_p2) target bundleno = 658 (0x292), region = 32  ;;  %p202_p3 = scmp.lt.s32.totalorder (!%p168_p2), %s827_s17, 3 }
   0x7   : > { %s958_s23 = smov (!%p168_p2), 1  }
   0xb   : > { %v956_v0 = vmov 0   ;;  %s1140_s17 = smov (!%p202_p3, %s827_s17), 3  ;;  %v1013_v13 = vld [vmem:[%s1131_s1 + $0x8] sm:$0xff]   ;;  %vm287_vm0 = vcmask 130048   ;;  %v238_v18 = vld [vmem:[%s1132_s2] sm:$0xff]  ;;  %v223_v20 = vlaneseq  ;;  %v947_v54 = vld [vmem:[%s1131_s1 + $0x10] sm:$0xff]  }
   0xc   : > { %323 = vmatprep.mubr.bf16.mxu0 %v956_v0  ;;  %374 = vmatprep.mubr.bf16.mxu1 %v956_v0  ;;  %s883_s18 = sshll.u32 %s1140_s17, 5  ;;  %v239_v19 = vld [vmem:[%s1132_s2 + $0x8] sm:$0xff]  ;;  %v946_v59 = vld [vmem:[%s1131_s1] sm:$0xff]   ;;  %s884_s8 = sshll.u32 %s1140_s17, 4  ;;  %vm496_vm7 = vcmask 7168   ;;  %vm499_vm8 = vcmask 15360  }
   0xd   : > { %943 = vset.pattern.permute.xlu0 %v956_v0  ;;  %944 = vset.pattern.permute.xlu1 %v956_v0  ;;  %s206_s21 = scalar_lea.vmem %s1130_s0, %s883_s18  ;;  %v1032_v21 = vand.u32 127, %v223_v20  ;;  %s1116_s11 = scalar_lea.vmem %s1133_s3, %s884_s8 }
   0xe   : > { %v240_v1 = vld [vmem:[%s206_s21] sm:$0xff]  ;;  %v242_v2 = vld [vmem:[%s206_s21 + $0x10] sm:$0xff]  ;;  %v241_v3 = vld [vmem:[%s206_s21 + $0x8] sm:$0xff]  ;;  %s220_s14 = scalar_lea.vmem %s1134_s4, %s884_s8 }
   0xf   : > { %v913_v4 = vpack.i.bf16 %v242_v2, %v240_v1  ;;  %v243_v5 = vld [vmem:[%s206_s21 + $0x18] sm:$0xff]  ;;  %v280_v6 = vpack.c.bf16 %v242_v2, %v240_v1  ;;  %v1002_v8 = vld [vmem:[%s206_s21 + $0x28] sm:$0xff]  ;;  %v1006_v11 = vld [vmem:[%s206_s21 + $0x20] sm:$0xff]  ;;  %v225_v24 = vadd.s32 128, %v1032_v21  ;;  %vm269_vm1 = vcmp.lt.s32.totalorder %v1032_v21, 127 }
  0x10   : > { %v918_v7 = vpack.i.bf16 %v243_v5, %v241_v3  ;;  %v281_v9 = vpack.c.bf16 %v243_v5, %v241_v3  ;;  %v1004_v10 = vld [vmem:[%s206_s21 + $0x38] sm:$0xff]  ;;  %v1008_v12 = vld [vmem:[%s206_s21 + $0x30] sm:$0xff]  ;;  %vm252_vm2 = vcmp.lt.s32.totalorder %v1032_v21, 1  ;;  %vm890_vm4 = vcmp.ne.s32.totalorder %v1032_v21, 0 }
  0x11   : > { %914 = vrot.lane.b32.xlu1 %v913_v4, %s957_s22  ;;  %904 = vrot.lane.b32.xlu0 %v913_v4, %s958_s23  ;;  %v542_v14 = vpack.c.bf16 %v1004_v10, %v1002_v8  ;;  %v541_v15 = vpack.c.bf16 %v1008_v12, %v1006_v11  ;;  %v928_v16 = vpack.i.bf16 %v1004_v10, %v1002_v8  ;;  %vm891_vm3 = vcmp.ne.s32.totalorder %v225_v24, 255  ;;  %vm1063_vm6 = vmpackc.low %vm890_vm4, %vm890_vm4 }
  0x12   : > { %305 = vmatprep.subr.bf16.mxu0 %v281_v9  ;;  %v923_v17 = vpack.i.bf16 %v1008_v12, %v1006_v11  ;;  %vm1046_vm5 = vmpackc.low %vm891_vm3, %vm891_vm3 }
  0x13   : > { %306 = vmatpush1.bf16.msra.mxu0 %v280_v6 }
  0x15   : > { %919 = vrot.lane.b32.xlu1 %v918_v7, %s957_s22  ;;  %909 = vrot.lane.b32.xlu0 %v918_v7, %s958_s23 }
  0x16   : > { %841 = vmatmul.mubr.msk.bf16.vlgmr.msra.gmra.mxu0 %vm287_vm0, %v1013_v13 }
  0x17   : > { %427 = vmatprep.mubr.bf16.mxu0 %v956_v0 }
  0x19   : > { %929 = vrot.lane.b32.xlu1 %v928_v16, %s958_s23  ;;  %924 = vrot.lane.b32.xlu0 %v923_v17, %s958_s23 }
  0x1d   : > { %939 = vrot.lane.b32.xlu1 %v928_v16, %s957_s22  ;;  %934 = vrot.lane.b32.xlu0 %v923_v17, %s957_s22 }
  0x21   : > { %444 = vperm.xlu0 %943, %v238_v18   ;;  %449 = vperm.xlu1 %944, %v239_v19  }
  0x83   : > { %v915_v22 = vpop.permute.xlu1 %914  ;;  %v905_v23 = vpop.permute.xlu0 %904 }
  0x84   : > { %v917_v25 = vunpack.i.h.bf16 %v915_v22  ;;  %v916_v26 = vunpack.i.l.bf16 %v915_v22  ;;  %v907_v33 = vunpack.i.h.bf16 %v905_v23  ;;  %v906_v34 = vunpack.i.l.bf16 %v905_v23 }
  0x87   : > { %v920_v27 = vpop.permute.xlu1 %919  ;;  %v910_v28 = vpop.permute.xlu0 %909 }
  0x88   : > { %v922_v29 = vunpack.i.h.bf16 %v920_v27  ;;  %v921_v30 = vunpack.i.l.bf16 %v920_v27  ;;  %v912_v31 = vunpack.i.h.bf16 %v910_v28  ;;  %v911_v32 = vunpack.i.l.bf16 %v910_v28 }
  0x8a   : > { %v270_v35 = vsel %vm269_vm1, %v916_v26, %v921_v30  ;;  %v271_v36 = vsel %vm269_vm1, %v917_v25, %v922_v29  ;;  %v272_v37 = vsel %vm269_vm1, %v921_v30, %v916_v26  ;;  %v273_v38 = vsel %vm269_vm1, %v922_v29, %v917_v25 }
  0x8b   : > { %v385_v40 = vpack.c.bf16 %v271_v36, %v270_v35  ;;  %v853_v41 = vpack.c.bf16 %v273_v38, %v272_v37  ;;  %v253_v42 = vsel %vm252_vm2, %v906_v34, %v911_v32  ;;  %v254_v43 = vsel %vm252_vm2, %v907_v33, %v912_v31  ;;  %v930_v44 = vpop.permute.xlu1 %929  ;;  %v925_v45 = vpop.permute.xlu0 %924 }
  0x8c   : > { %v279_v46 = vpack.c.bf16 %v254_v43, %v253_v42  ;;  %v932_v47 = vunpack.i.h.bf16 %v930_v44  ;;  %v931_v48 = vunpack.i.l.bf16 %v930_v44  ;;  %v927_v49 = vunpack.i.h.bf16 %v925_v45 }
  0x8d   : > { %854 = vmatprep.subr.msk.bf16.mxu0 %vm1046_vm5, %v853_v41  ;;  %v926_v50 = vunpack.i.l.bf16 %v925_v45  ;;  %v255_v51 = vsel %vm252_vm2, %v911_v32, %v906_v34  ;;  %v256_v52 = vsel %vm252_vm2, %v912_v31, %v907_v33 }
  0x8e   : > { %356 = vmatprep.subr.bf16.mxu1 %v279_v46  ;;  %v518_v55 = vsel %vm252_vm2, %v932_v47, %v927_v49  ;;  %v846_v56 = vpack.c.bf16 %v256_v52, %v255_v51  ;;  %410 = vmatpush1.bf16.msra.mxu0 %v385_v40  ;;  %v516_v57 = vsel %vm252_vm2, %v927_v49, %v932_v47 }
  0x8f   : > { %v517_v58 = vsel %vm252_vm2, %v931_v48, %v926_v50  ;;  %v940_v60 = vpop.permute.xlu1 %939  ;;  %v935_v61 = vpop.permute.xlu0 %934  ;;  %v515_v62 = vsel %vm252_vm2, %v926_v50, %v931_v48 }
  0x90   : > { %v866_v63 = vpack.c.bf16 %v518_v55, %v517_v58  ;;  %847 = vmatpush1.bf16.msk.msra.mxu1 %vm1063_vm6, %v846_v56  ;;  %v942_v1 = vunpack.i.h.bf16 %v940_v60  ;;  %v941_v2 = vunpack.i.l.bf16 %v940_v60  ;;  %v937_v3 = vunpack.i.h.bf16 %v935_v61 }
  0x91   : > { %855 = vmatmul.mubr.msk.bf16.vlgmr.msra.gmra.mxu0 %vm287_vm0, %v947_v54  ;;  %557 = vmatprep.subr.bf16.mxu1 %v542_v14  ;;  %v936_v4 = vunpack.i.l.bf16 %v935_v61  ;;  %v540_v5 = vpack.c.bf16 %v516_v57, %v515_v62 }
  0x92   : > { %v534_v6 = vsel %vm269_vm1, %v942_v1, %v937_v3  ;;  %618 = vmatprep.mubr.bf16.mxu0 %v956_v0  ;;  %v532_v8 = vsel %vm269_vm1, %v937_v3, %v942_v1 }
  0x93   : > { %848 = vmatmul.mubr.msk.bf16.vlgmr.msra.gmra.mxu1 %vm287_vm0, %v946_v59  ;;  %v533_v7 = vsel %vm269_vm1, %v941_v2, %v936_v4  ;;  %600 = vmatprep.subr.bf16.mxu0 %v540_v5  ;;  %v531_v10 = vsel %vm269_vm1, %v936_v4, %v941_v2 }
  0x94   : > { %v872_v9 = vpack.c.bf16 %v534_v6, %v533_v7  ;;  %558 = vmatpush1.bf16.msra.mxu1 %v541_v15  ;;  %867 = vmatpush1.bf16.msk.msra.mxu0 %vm1063_vm6, %v866_v63  ;;  %v629_v14 = vpack.c.bf16 %v532_v8, %v531_v10 }
  0x95   : > { %575 = vmatprep.mubr.bf16.mxu1 %v956_v0 }
  0x96   : > { %873 = vmatprep.subr.msk.bf16.mxu1 %vm1046_vm5, %v872_v9 }
  0x99   : > { %868 = vmatmul.mubr.msk.bf16.vlgmr.msra.gmra.mxu0 %vm287_vm0, %v946_v59 }
  0x9b   : > { %862 = vmatmul.mubr.msk.bf16.vlgmr.msra.gmra.mxu1 %vm287_vm0, %v1013_v13 }
  0x9c   : > { %646 = vmatpush1.bf16.msra.mxu1 %v629_v14  ;;  %663 = vmatprep.mubr.bf16.mxu1 %v956_v0  ;;  %v445_v13 = vpop.permute.xlu0 %444  ;;  %v450_v28 = vpop.permute.xlu1 %449 }
  0xa3   : > { %874 = vmatmul.mubr.msk.bf16.vlgmr.msra.gmra.mxu1 %vm287_vm0, %v947_v54 }
  0xd6   : > { %v325_v11 = vpop.f32.mrf.mxu0 }
  0xd8   : > { %v327_v12 = vpop.f32.mrf.mxu0 }
  0xda   : > { %v329_v15 = vpop.f32.mrf.mxu0 }
  0xdc   : > { %v331_v16 = vpop.f32.mrf.mxu0 }
 0x151   : > { %v429_v17 = vpop.f32.mrf.mxu0 }
 0x153   : > { %v376_v18 = vpop.f32.mrf.mxu1  ;;  %v431_v19 = vpop.f32.mrf.mxu0 }
 0x154   : > { %v377_v20 = vadd.f32 %v376_v18, %v325_v11 }
 0x155   : > { %v378_v21 = vpop.f32.mrf.mxu1  ;;  %v433_v22 = vpop.f32.mrf.mxu0 }
 0x156   : > { %v438_v23 = vadd.f32 %v429_v17, %v377_v20  ;;  %v379_v24 = vadd.f32 %v378_v21, %v327_v12 }
 0x157   : > { %v380_v25 = vpop.f32.mrf.mxu1  ;;  %v435_v26 = vpop.f32.mrf.mxu0 }
 0x158   : > { %v439_v0 = vadd.f32 %v431_v19, %v379_v24  ;;  %v381_v27 = vadd.f32 %v380_v25, %v329_v15  ;;  %v452_v31 = vadd.f32 %v445_v13, %v438_v23 }
 0x159   : > { %v382_v29 = vpop.f32.mrf.mxu1  ;;  %v620_v30 = vpop.f32.mrf.mxu0 }
 0x15a   : > { %v453_v32 = vadd.f32 %v445_v13, %v439_v0  ;;  %v440_v33 = vadd.f32 %v433_v22, %v381_v27  ;;  %v383_v34 = vadd.f32 %v382_v29, %v331_v16 }
 0x15b   : > { %v577_v35 = vpop.f32.mrf.mxu1  ;;  %v622_v40 = vpop.f32.mrf.mxu0 }
 0x15c   : > { %v886_v36 = vpack.c.bf16 %v453_v32, %v452_v31  ;;  %v441_v37 = vadd.f32 %v435_v26, %v383_v34  ;;  %v454_v38 = vadd.f32 %v450_v28, %v440_v33  ;;  %v621_v46 = vadd.f32 %v620_v30, %v577_v35 }
 0x15d   : > { %v579_v39 = vpop.f32.mrf.mxu1  ;;  %v624_v47 = vpop.f32.mrf.mxu0 }
 0x15e   : > { %v455_v41 = vadd.f32 %v450_v28, %v441_v37  ;;  %468 = vst [vmem:[%s1116_s11] sm:$0xff] %v886_v36  ;;  %v456_v42 = vpack.c.bf16 %v454_v38, %v452_v31  ;;  %v623_v54 = vadd.f32 %v622_v40, %v579_v39 }
 0x15f   : > { %v581_v43 = vpop.f32.mrf.mxu1  ;;  %v626_v58 = vpop.f32.mrf.mxu0 }
 0x160   : > { %v887_v44 = vpack.c.bf16 %v455_v41, %v454_v38  ;;  %v457_v45 = vpack.c.bf16 %v455_v41, %v453_v32  ;;  %v472_v49 = vunpack.c.h.bf16 %v456_v42  ;;  %v470_v51 = vunpack.c.l.bf16 %v456_v42 }
 0x161   : > { %v583_v48 = vpop.f32.mrf.mxu1  ;;  %v625_v60 = vadd.f32 %v624_v47, %v581_v43 }
 0x162   : > { %469 = vst [vmem:[%s1116_s11 + $0x8] sm:$0xff] %v887_v44  ;;  %v473_v50 = vunpack.c.h.bf16 %v457_v45  ;;  %v471_v52 = vunpack.c.l.bf16 %v457_v45  ;;  %v627_v63 = vadd.f32 %v626_v58, %v583_v48 }
 0x163   : > { %v665_v53 = vpop.f32.mrf.mxu1 }
 0x164   : > { %v674_v55 = vadd.f32 %v665_v53, %v621_v46  ;;  %v477_v56 = vadd.f32 %v473_v50, %v472_v49  ;;  %v474_v57 = vadd.f32 %v471_v52, %v470_v51 }
 0x165   : > { %v667_v59 = vpop.f32.mrf.mxu1 }
 0x166   : > { %v675_v61 = vadd.f32 %v667_v59, %v623_v54  ;;  %478 = vadd.xlane.f32.xlu0 %v477_v56  ;;  %475 = vadd.xlane.f32.xlu1 %v474_v57  ;;  %v678_v1 = vadd.f32 %v674_v55, %v445_v13 }
 0x167   : > { %v669_v62 = vpop.f32.mrf.mxu1 }
 0x168   : > { %v679_v2 = vadd.f32 %v675_v61, %v445_v13  ;;  %v676_v3 = vadd.f32 %v669_v62, %v625_v60 }
 0x169   : > { %v671_v4 = vpop.f32.mrf.mxu1 }
 0x16a   : > { %v888_v5 = vpack.c.bf16 %v679_v2, %v678_v1  ;;  %v680_v6 = vadd.f32 %v676_v3, %v450_v28  ;;  %v677_v7 = vadd.f32 %v671_v4, %v627_v63 }
 0x16c   : > { %877 = vst [vmem:[%s1116_s11 + $0x10] sm:$0xff] %v888_v5  ;;  %v682_v9 = vpack.c.bf16 %v680_v6, %v678_v1  ;;  %v681_v8 = vadd.f32 %v677_v7, %v450_v28 }
 0x16e   : > { %v683_v10 = vpack.c.bf16 %v681_v8, %v679_v2  ;;  %v889_v14 = vpack.c.bf16 %v681_v8, %v680_v6  ;;  %v697_v11 = vunpack.c.l.bf16 %v682_v9  ;;  %v699_v15 = vunpack.c.h.bf16 %v682_v9 }
 0x170   : > { %878 = vst [vmem:[%s1116_s11 + $0x18] sm:$0xff] %v889_v14  ;;  %v698_v12 = vunpack.c.l.bf16 %v683_v10  ;;  %v700_v16 = vunpack.c.h.bf16 %v683_v10 }
 0x172   : > { %v701_v17 = vadd.f32 %v698_v12, %v697_v11  ;;  %v704_v18 = vadd.f32 %v700_v16, %v699_v15 }
 0x174   : > { %702 = vadd.xlane.f32.xlu0 %v701_v17  ;;  %705 = vadd.xlane.f32.xlu1 %v704_v18 }
 0x1ef   : > { %v479_v19 = vpop.xlane.xlu0 %478  ;;  %v476_v20 = vpop.xlane.xlu1 %475 }
 0x1f0   : > { %v481_v21 = vmul.f32 0.00390625, %v479_v19  ;;  %v480_v22 = vmul.f32 0.00390625, %v476_v20 }
 0x1f2   : > { %v484_v23 = vsub.f32 %v472_v49, %v481_v21  ;;  %v485_v24 = vsub.f32 %v473_v50, %v481_v21  ;;  %v482_v13 = vsub.f32 %v470_v51, %v480_v22  ;;  %v483_v25 = vsub.f32 %v471_v52, %v480_v22 }
 0x1f4   : > { %v488_v26 = vmul.f32 %v484_v23, %v484_v23  ;;  %v489_v0 = vmul.f32 %v485_v24, %v485_v24  ;;  %v486_v27 = vmul.f32 %v482_v13, %v482_v13  ;;  %v487_v28 = vmul.f32 %v483_v25, %v483_v25 }
 0x1f6   : > { %v493_v29 = vadd.f32 %v489_v0, %v488_v26  ;;  %v490_v30 = vadd.f32 %v487_v28, %v486_v27 }
 0x1f8   : > { %494 = vadd.xlane.f32.xlu1 %v493_v29  ;;  %491 = vadd.xlane.f32.xlu0 %v490_v30 }
 0x1fd   : > { %v703_v31 = vpop.xlane.xlu0 %702  ;;  %v706_v32 = vpop.xlane.xlu1 %705 }
 0x1fe   : > { %v707_v33 = vmul.f32 0.00390625, %v703_v31  ;;  %v708_v34 = vmul.f32 0.00390625, %v706_v32 }
 0x200   : > { %v709_v35 = vsub.f32 %v697_v11, %v707_v33  ;;  %v710_v36 = vsub.f32 %v698_v12, %v707_v33  ;;  %v711_v37 = vsub.f32 %v699_v15, %v708_v34  ;;  %v712_v38 = vsub.f32 %v700_v16, %v708_v34 }
 0x202   : > { %v713_v39 = vmul.f32 %v709_v35, %v709_v35  ;;  %v714_v40 = vmul.f32 %v710_v36, %v710_v36  ;;  %v715_v41 = vmul.f32 %v711_v37, %v711_v37  ;;  %v716_v42 = vmul.f32 %v712_v38, %v712_v38 }
 0x204   : > { %v717_v43 = vadd.f32 %v714_v40, %v713_v39  ;;  %v720_v44 = vadd.f32 %v716_v42, %v715_v41 }
 0x206   : > { %718 = vadd.xlane.f32.xlu0 %v717_v43  ;;  %721 = vadd.xlane.f32.xlu1 %v720_v44 }
 0x281   : > { %v492_v45 = vpop.xlane.xlu0 %491  ;;  %v495_v46 = vpop.xlane.xlu1 %494 }
 0x282   : > { %v497_v47 = vsel %vm496_vm7, %v476_v20, %v492_v45  ;;  %v498_v48 = vsel %vm496_vm7, %v479_v19, %v495_v46 }
 0x283   : > { %500 = vst.msk [vmem:[%s220_s14] sm:$0xff] %vm499_vm8, %v497_v47  ;;  %501 = vst.msk [vmem:[%s220_s14 + $0x8] sm:$0xff] %vm499_vm8, %v498_v48 }
 0x28f   : > { %v719_v49 = vpop.xlane.xlu0 %718  ;;  %v722_v50 = vpop.xlane.xlu1 %721 }
 0x290   : > { %v723_v51 = vsel %vm496_vm7, %v703_v31, %v719_v49  ;;  %v724_v52 = vsel %vm496_vm7, %v706_v32, %v722_v50 }
 0x291   : > { %879 = vst.msk [vmem:[%s220_s14 + $0x10] sm:$0xff] %vm499_vm8, %v723_v51  ;;  %880 = vst.msk [vmem:[%s220_s14 + $0x18] sm:$0xff] %vm499_vm8, %v724_v52 }
 0x292 PF: > { %s15_s15 = sadd.s32 1, %s954_s15  }
 0x293   : > { %p12_p4 = scmp.ge.s32.totalorder %s15_s15, 4  }
 0x295   :  { %14 = sbr.rel (!%p12_p4) target bundleno = 1 (0x1), region = 79 }

// kernel: basic_conv_res_block.4
= control target key start
LH: loop header
LB: loop body
LE: loop exit
PB: predicated region body
PF: predicated region fallthrough
CT: control target
= control target key end

     0   :  { %s963_s18 = smov 0   ;;  %s1091_s0 = inlined_call_operand.vmem [shape: bf16[4,16,256], index: 0, kind: input, shape index: {}]   ;;  %s1092_s1 = inlined_call_operand.vmem [shape: f32[16,1], index: 1, kind: input, shape index: {}]   ;;  %s1093_s2 = inlined_call_operand.vmem [shape: f32[16,1], index: 2, kind: input, shape index: {}]   ;;  %s1094_s3 = inlined_call_operand.vmem [shape: bf16[3,16,16], index: 3, kind: input, shape index: {}]   ;;  %s1095_s4 = inlined_call_operand.vmem [shape: f32[16,1], index: 4, kind: input, shape index: {}]   ;;  %s1096_s5 = inlined_call_operand.vmem [shape: f32[4,16,2], index: 5, kind: output, shape index: {}]  }
   0x1 LB: > { %s812_s19 = sadd.s32 4294967295, %s928_s18   ;;  %p816_p0 = scmp.ge.s32.totalorder %s928_s18, 1  ;;  %s928_s18 = sphi %s963_s18, %s15_s18  }
   0x2   : > { %p189_p1 = scmp.lt.s32.totalorder %s928_s18, 3 }
   0x4   : > { %p190_p2 = pnand %p816_p0, %p189_p1 }
   0x5   : > { %s817_s28 = sshll.u32 (!%p190_p2), %s812_s19, 1  ;;  %s931_s8 = smov (!%p190_p2), 1  }
   0x6   : > { %193 = sbr.rel (%p190_p2) target bundleno = 781 (0x30d), region = 40  ;;  %p220_p3 = scmp.lt.s32.totalorder (!%p190_p2), %s817_s28, 3 }
   0x7   : > { %s932_s11 = smov (!%p190_p2), 127  }
   0xb   : > { %v253_v0 = vld [vmem:[%s1093_s2] sm:$0xff]  ;;  %v930_v2 = vmov 0   ;;  %v254_v3 = vld [vmem:[%s1093_s2 + $0x8] sm:$0xff]  ;;  %s1102_s28 = smov (!%p220_p3, %s817_s28), 3  ;;  %vm336_vm0 = vcmask 130048   ;;  %v234_v56 = vlaneseq  ;;  %vm527_vm7 = vcmask 7168  }
   0xc   : > { %v251_v1 = vld [vmem:[%s1092_s1] sm:$0xff]  ;;  %878 = vset.pattern.permute.xlu1 %v930_v2  ;;  %877 = vset.pattern.permute.xlu0 %v930_v2  ;;  %v252_v4 = vld [vmem:[%s1092_s1 + $0x8] sm:$0xff]  ;;  %s862_s29 = sshll.u32 %s1102_s28, 4  ;;  %vm530_vm8 = vcmask 15360  }
   0xd   : > { %277 = vperm.xlu1 %878, %v253_v0   ;;  %263 = vperm.xlu0 %877, %v251_v1   ;;  %s224_s7 = scalar_lea.vmem %s1091_s0, %s862_s29  ;;  %v998_v49 = vld [vmem:[%s1094_s3 + $0x8] sm:$0xff]   ;;  %v249_v55 = vld [vmem:[%s1095_s4] sm:$0xff]  ;;  %v1011_v57 = vand.u32 127, %v234_v56  ;;  %s231_s23 = scalar_lea.vmem %s1096_s5, %s862_s29 }
   0xe   : > { %372 = vmatprep.mubr.bf16.mxu0 %v930_v2  ;;  %423 = vmatprep.mubr.bf16.mxu1 %v930_v2  ;;  %v255_v5 = vld [vmem:[%s224_s7] sm:$0xff]  ;;  %v843_v6 = vld [vmem:[%s224_s7 + $0x10] sm:$0xff]  ;;  %v256_v10 = vld [vmem:[%s224_s7 + $0x8] sm:$0xff] }
   0xf   : > { %v257_v7 = vunpack.c.l.bf16 %v255_v5  ;;  %v258_v8 = vunpack.c.h.bf16 %v255_v5  ;;  %v537_v9 = vunpack.c.h.bf16 %v843_v6  ;;  %v844_v11 = vld [vmem:[%s224_s7 + $0x18] sm:$0xff]  ;;  %v536_v16 = vunpack.c.l.bf16 %v843_v6  ;;  %v250_v54 = vld [vmem:[%s1095_s4 + $0x8] sm:$0xff] }
  0x10   : > { %v259_v17 = vunpack.c.l.bf16 %v256_v10  ;;  %v260_v18 = vunpack.c.h.bf16 %v256_v10  ;;  %v538_v19 = vunpack.c.l.bf16 %v844_v11  ;;  %v539_v20 = vunpack.c.h.bf16 %v844_v11 }
  0x11   : > { %282 = vperm.xlu1 %878, %v254_v3   ;;  %268 = vperm.xlu0 %877, %v252_v4   ;;  %v236_v58 = vadd.s32 128, %v1011_v57  ;;  %vm301_vm1 = vcmp.lt.s32.totalorder %v1011_v57, 1  ;;  %vm864_vm2 = vcmp.ne.s32.totalorder %v1011_v57, 0  ;;  %vm318_vm3 = vcmp.lt.s32.totalorder %v1011_v57, 127 }
  0x12   : > { %vm1025_vm5 = vmpackc.low %vm864_vm2, %vm864_vm2 }
  0x13   : > { %vm865_vm4 = vcmp.ne.s32.totalorder %v236_v58, 255 }
  0x14   : > { %vm1044_vm6 = vmpackc.low %vm865_vm4, %vm865_vm4 }
  0x88   : > { %v264_v12 = vpop.permute.xlu0 %263  ;;  %v278_v13 = vpop.permute.xlu1 %277 }
  0x89   : > { %v271_v14 = vmul.f32 %v264_v12, %v257_v7  ;;  %v272_v15 = vmul.f32 %v264_v12, %v258_v8  ;;  %v541_v21 = vmul.f32 %v537_v9, %v264_v12  ;;  %v540_v25 = vmul.f32 %v536_v16, %v264_v12 }
  0x8b   : > { %v285_v23 = vadd.f32 %v278_v13, %v271_v14  ;;  %v286_v24 = vadd.f32 %v278_v13, %v272_v15  ;;  %v545_v30 = vadd.f32 %v541_v21, %v278_v13  ;;  %v544_v37 = vadd.f32 %v540_v25, %v278_v13  ;;  %v920_v15 = vld [vmem:[%s1094_s3] sm:$0xff]  }
  0x8c   : > { %v269_v22 = vpop.permute.xlu0 %268  ;;  %v283_v31 = vpop.permute.xlu1 %282 }
  0x8d   : > { %v273_v26 = vmul.f32 %v269_v22, %v259_v17  ;;  %v274_v27 = vmul.f32 %v269_v22, %v260_v18  ;;  %v542_v28 = vmul.f32 %v538_v19, %v269_v22  ;;  %v543_v29 = vmul.f32 %v539_v20, %v269_v22 }
  0x8e   : > { %v289_v36 = vmax.f32 %v285_v23, 0.0  ;;  %v290_v38 = vmax.f32 %v286_v24, 0.0  ;;  %v549_v42 = vmax.f32 %v545_v30, 0.0  ;;  %v548_v48 = vmax.f32 %v544_v37, 0.0 }
  0x8f   : > { %v287_v32 = vadd.f32 %v283_v31, %v273_v26  ;;  %v288_v33 = vadd.f32 %v283_v31, %v274_v27  ;;  %v546_v34 = vadd.f32 %v542_v28, %v283_v31  ;;  %v547_v35 = vadd.f32 %v543_v29, %v283_v31  ;;  %v921_v29 = vld [vmem:[%s1094_s3 + $0x10] sm:$0xff]  }
  0x91   : > { %v291_v39 = vmax.f32 %v287_v32, 0.0  ;;  %v292_v40 = vmax.f32 %v288_v33, 0.0  ;;  %v551_v41 = vmax.f32 %v547_v35, 0.0  ;;  %v550_v43 = vmax.f32 %v546_v34, 0.0 }
  0x93   : > { %v884_v44 = vpack.i.bf16 %v292_v40, %v290_v38  ;;  %v330_v45 = vpack.c.bf16 %v292_v40, %v290_v38  ;;  %v879_v46 = vpack.i.bf16 %v291_v39, %v289_v36  ;;  %v329_v47 = vpack.c.bf16 %v291_v39, %v289_v36 }
  0x94   : > { %v587_v50 = vpack.c.bf16 %v551_v41, %v549_v42  ;;  %v1000_v51 = vpack.c.bf16 %v550_v43, %v548_v48  ;;  %v904_v52 = vpack.i.bf16 %v551_v41, %v549_v42  ;;  %v899_v53 = vpack.i.bf16 %v550_v43, %v548_v48 }
  0x95   : > { %885 = vrot.lane.b32.xlu1 %v884_v44, %s931_s8  ;;  %354 = vmatprep.subr.bf16.mxu0 %v330_v45 }
  0x96   : > { %880 = vrot.lane.b32.xlu0 %v879_v46, %s931_s8  ;;  %355 = vmatpush1.bf16.msra.mxu0 %v329_v47 }
  0x99   : > { %895 = vrot.lane.b32.xlu1 %v884_v44, %s932_s11  ;;  %828 = vmatmul.mubr.msk.bf16.vlgmr.msra.gmra.mxu0 %vm336_vm0, %v998_v49 }
  0x9a   : > { %890 = vrot.lane.b32.xlu0 %v879_v46, %s932_s11  ;;  %476 = vmatprep.mubr.bf16.mxu0 %v930_v2 }
  0x9d   : > { %905 = vrot.lane.b32.xlu1 %v904_v52, %s931_s8 }
  0x9e   : > { %900 = vrot.lane.b32.xlu0 %v899_v53, %s931_s8 }
  0xa1   : > { %915 = vrot.lane.b32.xlu1 %v904_v52, %s932_s11 }
  0xa2   : > { %910 = vrot.lane.b32.xlu0 %v899_v53, %s932_s11 }
  0xa5   : > { %498 = vperm.xlu1 %878, %v250_v54  }
  0xa6   : > { %493 = vperm.xlu0 %877, %v249_v55  }
 0x107   : > { %v886_v59 = vpop.permute.xlu1 %885 }
 0x108   : > { %v888_v60 = vunpack.i.h.bf16 %v886_v59  ;;  %v887_v61 = vunpack.i.l.bf16 %v886_v59  ;;  %v881_v62 = vpop.permute.xlu0 %880 }
 0x109   : > { %v883_v63 = vunpack.i.h.bf16 %v881_v62  ;;  %v882_v0 = vunpack.i.l.bf16 %v881_v62 }
 0x10b   : > { %v896_v1 = vpop.permute.xlu1 %895  ;;  %v302_v3 = vsel %vm301_vm1, %v882_v0, %v887_v61  ;;  %v303_v4 = vsel %vm301_vm1, %v883_v63, %v888_v60  ;;  %v304_v5 = vsel %vm301_vm1, %v887_v61, %v882_v0  ;;  %v305_v6 = vsel %vm301_vm1, %v888_v60, %v883_v63 }
 0x10c   : > { %v898_v7 = vunpack.i.h.bf16 %v896_v1  ;;  %v897_v8 = vunpack.i.l.bf16 %v896_v1  ;;  %v891_v9 = vpop.permute.xlu0 %890  ;;  %v328_v10 = vpack.c.bf16 %v303_v4, %v302_v3  ;;  %v833_v12 = vpack.c.bf16 %v305_v6, %v304_v5 }
 0x10d   : > { %v893_v13 = vunpack.i.h.bf16 %v891_v9  ;;  %v892_v14 = vunpack.i.l.bf16 %v891_v9 }
 0x10e   : > { %405 = vmatprep.subr.bf16.mxu1 %v328_v10 }
 0x10f   : > { %v320_v16 = vsel %vm318_vm3, %v893_v13, %v898_v7  ;;  %v322_v17 = vsel %vm318_vm3, %v898_v7, %v893_v13  ;;  %v319_v18 = vsel %vm318_vm3, %v892_v14, %v897_v8  ;;  %v321_v19 = vsel %vm318_vm3, %v897_v8, %v892_v14  ;;  %834 = vmatpush1.bf16.msk.msra.mxu1 %vm1025_vm5, %v833_v12  ;;  %v906_v20 = vpop.permute.xlu1 %905 }
 0x110   : > { %v434_v22 = vpack.c.bf16 %v320_v16, %v319_v18  ;;  %v840_v23 = vpack.c.bf16 %v322_v17, %v321_v19  ;;  %v908_v24 = vunpack.i.h.bf16 %v906_v20  ;;  %v907_v25 = vunpack.i.l.bf16 %v906_v20  ;;  %v901_v26 = vpop.permute.xlu0 %900  ;;  %602 = vmatprep.subr.bf16.mxu1 %v587_v50 }
 0x111   : > { %v903_v27 = vunpack.i.h.bf16 %v901_v26  ;;  %v902_v28 = vunpack.i.l.bf16 %v901_v26 }
 0x112   : > { %835 = vmatmul.mubr.msk.bf16.vlgmr.msra.gmra.mxu1 %vm336_vm0, %v920_v15  ;;  %841 = vmatprep.subr.msk.bf16.mxu0 %vm1044_vm6, %v840_v23 }
 0x113   : > { %v563_v30 = vsel %vm301_vm1, %v908_v24, %v903_v27  ;;  %v562_v31 = vsel %vm301_vm1, %v907_v25, %v902_v28  ;;  %459 = vmatpush1.bf16.msra.mxu0 %v434_v22  ;;  %603 = vmatpush1.bf16.msra.mxu1 %v1000_v51  ;;  %v916_v32 = vpop.permute.xlu1 %915  ;;  %v560_v33 = vsel %vm301_vm1, %v902_v28, %v907_v25 }
 0x114   : > { %v849_v34 = vpack.c.bf16 %v563_v30, %v562_v31  ;;  %v918_v35 = vunpack.i.h.bf16 %v916_v32  ;;  %v917_v36 = vunpack.i.l.bf16 %v916_v32  ;;  %v911_v37 = vpop.permute.xlu0 %910  ;;  %v561_v38 = vsel %vm301_vm1, %v903_v27, %v908_v24  ;;  %620 = vmatprep.mubr.bf16.mxu1 %v930_v2 }
 0x115   : > { %v913_v39 = vunpack.i.h.bf16 %v911_v37  ;;  %v912_v40 = vunpack.i.l.bf16 %v911_v37  ;;  %v585_v41 = vpack.c.bf16 %v561_v38, %v560_v33 }
 0x116   : > { %842 = vmatmul.mubr.msk.bf16.vlgmr.msra.gmra.mxu0 %vm336_vm0, %v921_v29 }
 0x117   : > { %v577_v42 = vsel %vm318_vm3, %v913_v39, %v918_v35  ;;  %v579_v43 = vsel %vm318_vm3, %v918_v35, %v913_v39  ;;  %v576_v44 = vsel %vm318_vm3, %v912_v40, %v917_v36  ;;  %v578_v45 = vsel %vm318_vm3, %v917_v36, %v912_v40  ;;  %645 = vmatprep.subr.bf16.mxu0 %v585_v41 }
 0x118   : > { %v674_v46 = vpack.c.bf16 %v577_v42, %v576_v44  ;;  %v855_v47 = vpack.c.bf16 %v579_v43, %v578_v45  ;;  %850 = vmatpush1.bf16.msk.msra.mxu0 %vm1025_vm5, %v849_v34  ;;  %663 = vmatprep.mubr.bf16.mxu0 %v930_v2 }
 0x11a   : > { %845 = vmatmul.mubr.msk.bf16.vlgmr.msra.gmra.mxu1 %vm336_vm0, %v998_v49  ;;  %856 = vmatprep.subr.msk.bf16.mxu1 %vm1044_vm6, %v855_v47 }
 0x11b   : > { %691 = vmatpush1.bf16.msra.mxu1 %v674_v46  ;;  %708 = vmatprep.mubr.bf16.mxu1 %v930_v2 }
 0x11e   : > { %851 = vmatmul.mubr.msk.bf16.vlgmr.msra.gmra.mxu0 %vm336_vm0, %v920_v15 }
 0x120   : > { %v499_v8 = vpop.permute.xlu1 %498 }
 0x121   : > { %v494_v61 = vpop.permute.xlu0 %493 }
 0x122   : > { %857 = vmatmul.mubr.msk.bf16.vlgmr.msra.gmra.mxu1 %vm336_vm0, %v921_v29 }
 0x159   : > { %v374_v48 = vpop.f32.mrf.mxu0 }
 0x15b   : > { %v376_v50 = vpop.f32.mrf.mxu0 }
 0x15d   : > { %v378_v51 = vpop.f32.mrf.mxu0 }
 0x15f   : > { %v380_v53 = vpop.f32.mrf.mxu0 }
 0x1d2   : > { %v425_v52 = vpop.f32.mrf.mxu1 }
 0x1d3   : > { %v426_v55 = vadd.f32 %v425_v52, %v374_v48 }
 0x1d4   : > { %v427_v54 = vpop.f32.mrf.mxu1 }
 0x1d5   : > { %v428_v49 = vadd.f32 %v427_v54, %v376_v50 }
 0x1d6   : > { %v429_v56 = vpop.f32.mrf.mxu1  ;;  %v478_v57 = vpop.f32.mrf.mxu0 }
 0x1d7   : > { %v487_v58 = vadd.f32 %v478_v57, %v426_v55  ;;  %v430_v62 = vadd.f32 %v429_v56, %v378_v51 }
 0x1d8   : > { %v431_v59 = vpop.f32.mrf.mxu1  ;;  %v480_v60 = vpop.f32.mrf.mxu0 }
 0x1d9   : > { %v488_v2 = vadd.f32 %v480_v60, %v428_v49  ;;  %v501_v1 = vadd.f32 %v494_v61, %v487_v58  ;;  %v432_v3 = vadd.f32 %v431_v59, %v380_v53 }
 0x1da   : > { %v482_v63 = vpop.f32.mrf.mxu0  ;;  %v622_v0 = vpop.f32.mrf.mxu1 }
 0x1db   : > { %v502_v4 = vadd.f32 %v494_v61, %v488_v2  ;;  %v489_v5 = vadd.f32 %v482_v63, %v430_v62 }
 0x1dc   : > { %v484_v6 = vpop.f32.mrf.mxu0  ;;  %v624_v7 = vpop.f32.mrf.mxu1 }
 0x1dd   : > { %v490_v9 = vadd.f32 %v484_v6, %v432_v3  ;;  %v505_v10 = vadd.f32 %v502_v4, %v501_v1  ;;  %v503_v13 = vadd.f32 %v499_v8, %v489_v5 }
 0x1de   : > { %v626_v11 = vpop.f32.mrf.mxu1  ;;  %v665_v12 = vpop.f32.mrf.mxu0 }
 0x1df   : > { %v504_v14 = vadd.f32 %v499_v8, %v490_v9  ;;  %506 = vadd.xlane.f32.xlu0 %v505_v10  ;;  %v666_v17 = vadd.f32 %v665_v12, %v622_v0 }
 0x1e0   : > { %v628_v15 = vpop.f32.mrf.mxu1  ;;  %v667_v16 = vpop.f32.mrf.mxu0 }
 0x1e1   : > { %v508_v18 = vadd.f32 %v504_v14, %v503_v13  ;;  %v668_v21 = vadd.f32 %v667_v16, %v624_v7 }
 0x1e2   : > { %v669_v19 = vpop.f32.mrf.mxu0  ;;  %v710_v20 = vpop.f32.mrf.mxu1 }
 0x1e3   : > { %v719_v22 = vadd.f32 %v710_v20, %v666_v17  ;;  %509 = vadd.xlane.f32.xlu1 %v508_v18  ;;  %v670_v25 = vadd.f32 %v669_v19, %v626_v11 }
 0x1e4   : > { %v671_v23 = vpop.f32.mrf.mxu0  ;;  %v712_v24 = vpop.f32.mrf.mxu1 }
 0x1e5   : > { %v720_v26 = vadd.f32 %v712_v24, %v668_v21  ;;  %v723_v28 = vadd.f32 %v719_v22, %v494_v61  ;;  %v672_v29 = vadd.f32 %v671_v23, %v628_v15 }
 0x1e6   : > { %v714_v27 = vpop.f32.mrf.mxu1 }
 0x1e7   : > { %v724_v30 = vadd.f32 %v720_v26, %v494_v61  ;;  %v721_v31 = vadd.f32 %v714_v27, %v670_v25 }
 0x1e8   : > { %v716_v32 = vpop.f32.mrf.mxu1 }
 0x1e9   : > { %v722_v33 = vadd.f32 %v716_v32, %v672_v29  ;;  %v727_v34 = vadd.f32 %v724_v30, %v723_v28  ;;  %v725_v35 = vadd.f32 %v721_v31, %v499_v8 }
 0x1eb   : > { %v726_v36 = vadd.f32 %v722_v33, %v499_v8  ;;  %728 = vadd.xlane.f32.xlu0 %v727_v34 }
 0x1ed   : > { %v730_v37 = vadd.f32 %v726_v36, %v725_v35 }
 0x1ef   : > { %731 = vadd.xlane.f32.xlu0 %v730_v37 }
 0x268   : > { %v507_v38 = vpop.xlane.xlu0 %506 }
 0x269   : > { %v511_v39 = vmul.f32 0.00390625, %v507_v38 }
 0x26b   : > { %v513_v40 = vsub.f32 %v501_v1, %v511_v39  ;;  %v514_v41 = vsub.f32 %v502_v4, %v511_v39 }
 0x26c   : > { %v510_v42 = vpop.xlane.xlu1 %509 }
 0x26d   : > { %v512_v43 = vmul.f32 0.00390625, %v510_v42  ;;  %v517_v44 = vmul.f32 %v513_v40, %v513_v40  ;;  %v518_v45 = vmul.f32 %v514_v41, %v514_v41 }
 0x26f   : > { %v515_v46 = vsub.f32 %v503_v13, %v512_v43  ;;  %v516_v47 = vsub.f32 %v504_v14, %v512_v43  ;;  %v521_v48 = vadd.f32 %v518_v45, %v517_v44 }
 0x271   : > { %522 = vadd.xlane.f32.xlu1 %v521_v48  ;;  %v519_v50 = vmul.f32 %v515_v46, %v515_v46  ;;  %v520_v51 = vmul.f32 %v516_v47, %v516_v47 }
 0x273   : > { %v524_v52 = vadd.f32 %v520_v51, %v519_v50 }
 0x274   : > { %v729_v53 = vpop.xlane.xlu0 %728 }
 0x275   : > { %v733_v54 = vmul.f32 0.00390625, %v729_v53  ;;  %525 = vadd.xlane.f32.xlu0 %v524_v52 }
 0x277   : > { %v735_v55 = vsub.f32 %v723_v28, %v733_v54  ;;  %v736_v56 = vsub.f32 %v724_v30, %v733_v54 }
 0x278   : > { %v732_v57 = vpop.xlane.xlu0 %731 }
 0x279   : > { %v734_v49 = vmul.f32 0.00390625, %v732_v57  ;;  %v739_v58 = vmul.f32 %v735_v55, %v735_v55  ;;  %v740_v59 = vmul.f32 %v736_v56, %v736_v56 }
 0x27b   : > { %v737_v60 = vsub.f32 %v725_v35, %v734_v49  ;;  %v738_v61 = vsub.f32 %v726_v36, %v734_v49  ;;  %v743_v62 = vadd.f32 %v740_v59, %v739_v58 }
 0x27d   : > { %744 = vadd.xlane.f32.xlu1 %v743_v62  ;;  %v741_v2 = vmul.f32 %v737_v60, %v737_v60  ;;  %v742_v63 = vmul.f32 %v738_v61, %v738_v61 }
 0x27f   : > { %v746_v0 = vadd.f32 %v742_v63, %v741_v2 }
 0x281   : > { %747 = vadd.xlane.f32.xlu0 %v746_v0 }
 0x2fa   : > { %v523_v1 = vpop.xlane.xlu1 %522 }
 0x2fb   : > { %v528_v3 = vsel %vm527_vm7, %v507_v38, %v523_v1 }
 0x2fc   : > { %531 = vst.msk [vmem:[%s231_s23] sm:$0xff] %vm530_vm8, %v528_v3 }
 0x2fe   : > { %v526_v4 = vpop.xlane.xlu0 %525 }
 0x2ff   : > { %v529_v5 = vsel %vm527_vm7, %v510_v42, %v526_v4 }
 0x300   : > { %532 = vst.msk [vmem:[%s231_s23 + $0x8] sm:$0xff] %vm530_vm8, %v529_v5 }
 0x306   : > { %v745_v6 = vpop.xlane.xlu1 %744 }
 0x307   : > { %v749_v7 = vsel %vm527_vm7, %v729_v53, %v745_v6 }
 0x308   : > { %858 = vst.msk [vmem:[%s231_s23 + $0x10] sm:$0xff] %vm530_vm8, %v749_v7 }
 0x30a   : > { %v748_v8 = vpop.xlane.xlu0 %747 }
 0x30b   : > { %v750_v9 = vsel %vm527_vm7, %v732_v57, %v748_v8 }
 0x30c   : > { %859 = vst.msk [vmem:[%s231_s23 + $0x18] sm:$0xff] %vm530_vm8, %v750_v9 }
 0x30d PF: > { %s15_s18 = sadd.s32 1, %s928_s18  }
 0x30e   : > { %p12_p4 = scmp.ge.s32.totalorder %s15_s18, 4  }
 0x310   :  { %14 = sbr.rel (!%p12_p4) target bundleno = 1 (0x1), region = 74 }

// kernel: basic_conv_res_block.5
= control target key start
LH: loop header
LB: loop body
LE: loop exit
PB: predicated region body
PF: predicated region fallthrough
CT: control target
= control target key end

     0   :  { %13 = vsyncpa [#allocation3], 0  ;;  %s1508_s0 = inlined_call_operand.vmem [shape: bf16[4,16,256], index: 0, kind: input, shape index: {}]   ;;  %s1509_s1 = inlined_call_operand.vmem [shape: f32[16,1], index: 1, kind: input, shape index: {}]   ;;  %s1510_s2 = inlined_call_operand.vmem [shape: f32[16,1], index: 2, kind: input, shape index: {}]   ;;  %s1511_s3 = inlined_call_operand.vmem [shape: bf16[3,16,16], index: 3, kind: input, shape index: {}]   ;;  %s1512_s4 = inlined_call_operand.vmem [shape: f32[16,1], index: 4, kind: input, shape index: {}]   ;;  %s1513_s5 = inlined_call_operand.vmem [shape: f32[16,1], index: 5, kind: input, shape index: {}]   ;;  %s1514_s6 = inlined_call_operand.vmem [shape: f32[16,1], index: 6, kind: input, shape index: {}]   ;;  %s1515_s7 = inlined_call_operand.vmem [shape: f32[4,16,256], index: 7, kind: input, shape index: {}]   ;;  %s1516_s8 = inlined_call_operand.hbm [shape: f32[4,16,256], index: 8, kind: output, shape index: {}]  }
   0x1   :  { %15 = vsyncpa [#allocation3 + $0x1], 0  ;;  %s1232_s27 = smov 0   ;;  %s1234_s28 = smov 0  }
   0x2   :  { %s1236_s29 = smov 0   ;;  %s1238_s30 = smov 0  }
   0x3 LB: > { %s1253_s9 = sadd.s32 4294967295, %s1179_s30   ;;  %s964_s10 = sadd.s32 4294967294, %s1179_s30   ;;  %s1179_s30 = sphi %s1238_s30, %s1526_s30   ;;  %s1175_s29 = sphi %s1236_s29, %s1525_s29   ;;  %s1171_s28 = sphi %s1234_s28, %s1524_s28   ;;  %s1167_s27 = sphi %s1232_s27, %s1523_s27  }
   0x4   : > { %s1257_s11 = sadd.s32 1, %s1179_s30   ;;  %s206_s12 = sadd.s32 1, %s1175_s29 }
   0x5   : > { %s203_s13 = ssub.s32 %s1179_s30, %s1257_s11  ;;  %p216_p0 = scmp.ne.s32.totalorder %s1175_s29, %s1171_s28 }
   0x6   : > { %p204_p1 = scmp.eq.s32.totalorder %s203_s13, 0  ;;  %p217_p2 = scmp.eq.s32.totalorder %s1253_s9, 1 }
   0x7   : > { %p222_p3 = scmp.ne.s32.totalorder %s1171_s28, %s1167_s27  ;;  %p223_p4 = scmp.eq.s32.totalorder %s964_s10, 1 }
   0x8   : > { %s1268_s14 = scalar_select %p204_p1, %s1175_s29, %s206_s12  }
   0x9   : > { %p1270_p5 = por %p217_p2, %p216_p0  ;;  %p1274_p6 = por %p223_p4, %p222_p3 }
   0xa   : > { %p967_p7 = scmp.ge.s32.totalorder %s1179_s30, 1  ;;  %p279_p8 = scmp.lt.s32.totalorder %s1179_s30, 3 }
   0xc   : > { %p280_p9 = pnand %p967_p7, %p279_p8 }
   0xd   : > { %s969_s25 = sshll.u32 (!%p280_p9), %s1253_s9, 1  ;;  %s1182_s17 = smov (!%p280_p9), 1  }
   0xe   : > { %283 = sbr.rel (%p280_p9) target bundleno = 523 (0x20b), region = 52  ;;  %p321_p10 = scmp.lt.s32.totalorder (!%p280_p9), %s969_s25, 3 }
   0xf   : > { %s1183_s20 = smov (!%p280_p9), 127   ;;  %s1027_s19 = sshll.u32 (!%p280_p9), %s1253_s9, 10 }
  0x10   : > { %s1460_s23 = scalar_lea.hbm (!%p280_p9), %s1516_s8, %s1027_s19 }
  0x13   : > { %v355_v0 = vld [vmem:[%s1510_s2] sm:$0xff]  ;;  %v1181_v2 = vmov 0   ;;  %v356_v3 = vld [vmem:[%s1510_s2 + $0x8] sm:$0xff]  ;;  %s1528_s25 = smov (!%p321_p10, %s969_s25), 3  ;;  %vm442_vm0 = vcmask 130048   ;;  %v336_v60 = vlaneseq }
  0x14   : > { %v353_v1 = vld [vmem:[%s1509_s1] sm:$0xff]  ;;  %1075 = vset.pattern.permute.xlu1 %v1181_v2  ;;  %1074 = vset.pattern.permute.xlu0 %v1181_v2  ;;  %v354_v4 = vld [vmem:[%s1509_s1 + $0x8] sm:$0xff]  ;;  %s1024_s26 = sshll.u32 %s1528_s25, 4 }
  0x15   : > { %383 = vperm.xlu1 %1075, %v355_v0   ;;  %369 = vperm.xlu0 %1074, %v353_v1   ;;  %s325_s13 = scalar_lea.vmem %s1508_s0, %s1024_s26  ;;  %v1306_v49 = vld [vmem:[%s1511_s3 + $0x8] sm:$0xff]   ;;  %v351_v55 = vld [vmem:[%s1512_s4] sm:$0xff]  ;;  %v1333_v61 = vand.u32 127, %v336_v60  ;;  %s1025_s26 = sshll.u32 %s1528_s25, 5 }
  0x16   : > { %478 = vmatprep.mubr.bf16.mxu0 %v1181_v2  ;;  %529 = vmatprep.mubr.bf16.mxu1 %v1181_v2  ;;  %v361_v5 = vld [vmem:[%s325_s13] sm:$0xff]  ;;  %v995_v6 = vld [vmem:[%s325_s13 + $0x10] sm:$0xff]  ;;  %v362_v10 = vld [vmem:[%s325_s13 + $0x8] sm:$0xff]  ;;  %s317_s25 = sand.u32 1, %s1171_s28  }
  0x17   : > { %v363_v7 = vunpack.c.l.bf16 %v361_v5  ;;  %v364_v8 = vunpack.c.h.bf16 %v361_v5  ;;  %v659_v9 = vunpack.c.h.bf16 %v995_v6  ;;  %v996_v11 = vld [vmem:[%s325_s13 + $0x18] sm:$0xff]  ;;  %v658_v16 = vunpack.c.l.bf16 %v995_v6  ;;  %v352_v54 = vld [vmem:[%s1512_s4 + $0x8] sm:$0xff]  ;;  %v357_v57 = vld [vmem:[%s1513_s5] sm:$0xff]  ;;  %s1416_s13 = scalar_lea.vmem %s1515_s7, %s1025_s26  ;;  %s1468_s9 = scalar_lea.sflag [#allocation3], %s317_s25 }
  0x18   : > { %v365_v17 = vunpack.c.l.bf16 %v362_v10  ;;  %v366_v18 = vunpack.c.h.bf16 %v362_v10  ;;  %v660_v19 = vunpack.c.l.bf16 %v996_v11  ;;  %v661_v20 = vunpack.c.h.bf16 %v996_v11  ;;  %v358_v56 = vld [vmem:[%s1513_s5 + $0x8] sm:$0xff]  ;;  %v359_v59 = vld [vmem:[%s1514_s6] sm:$0xff]  ;;  %s1184_s26 = smov [#allocation2]  }
  0x19   : > { %388 = vperm.xlu1 %1075, %v356_v3   ;;  %374 = vperm.xlu0 %1074, %v354_v4   ;;  %v360_v58 = vld [vmem:[%s1514_s6 + $0x8] sm:$0xff]  ;;  %v338_v62 = vadd.s32 128, %v1333_v61  ;;  %vm407_vm1 = vcmp.lt.s32.totalorder %v1333_v61, 1  ;;  %vm1028_vm2 = vcmp.ne.s32.totalorder %v1333_v61, 0  ;;  %vm424_vm3 = vcmp.lt.s32.totalorder %v1333_v61, 127  ;;  %s1123_s10 = sshll.u32 %s1184_s26, 4  ;;  %s1124_s10 = int_to_ptr.vmem [resolvable:$false] %s1123_s10 }
  0x1a   : > { %vm1347_vm5 = vmpackc.low %vm1028_vm2, %vm1028_vm2  ;;  %s1125_s12 = scalar_lea.vmem %s1124_s10, 2048 }
  0x1b   : > { %vm1029_vm4 = vcmp.ne.s32.totalorder %v338_v62, 255 }
  0x1c   : > { %vm1366_vm6 = vmpackc.low %vm1029_vm4, %vm1029_vm4 }
  0x90   : > { %v370_v12 = vpop.permute.xlu0 %369  ;;  %v384_v13 = vpop.permute.xlu1 %383 }
  0x91   : > { %v377_v14 = vmul.f32 %v370_v12, %v363_v7  ;;  %v378_v15 = vmul.f32 %v370_v12, %v364_v8  ;;  %v663_v21 = vmul.f32 %v659_v9, %v370_v12  ;;  %v662_v25 = vmul.f32 %v658_v16, %v370_v12 }
  0x93   : > { %v391_v23 = vadd.f32 %v384_v13, %v377_v14  ;;  %v392_v24 = vadd.f32 %v384_v13, %v378_v15  ;;  %v667_v30 = vadd.f32 %v663_v21, %v384_v13  ;;  %v666_v37 = vadd.f32 %v662_v25, %v384_v13  ;;  %v639_v15 = vld [vmem:[%s1416_s13] sm:$0xff] }
  0x94   : > { %v375_v22 = vpop.permute.xlu0 %374  ;;  %v389_v31 = vpop.permute.xlu1 %388 }
  0x95   : > { %v379_v26 = vmul.f32 %v375_v22, %v365_v17  ;;  %v380_v27 = vmul.f32 %v375_v22, %v366_v18  ;;  %v664_v28 = vmul.f32 %v660_v19, %v375_v22  ;;  %v665_v29 = vmul.f32 %v661_v20, %v375_v22  ;;  %v1117_v19 = vld [vmem:[%s1511_s3] sm:$0xff]  }
  0x96   : > { %v395_v36 = vmax.f32 %v391_v23, 0.0  ;;  %v396_v38 = vmax.f32 %v392_v24, 0.0  ;;  %v671_v42 = vmax.f32 %v667_v30, 0.0  ;;  %v670_v48 = vmax.f32 %v666_v37, 0.0 }
  0x97   : > { %v393_v32 = vadd.f32 %v389_v31, %v379_v26  ;;  %v394_v33 = vadd.f32 %v389_v31, %v380_v27  ;;  %v668_v34 = vadd.f32 %v664_v28, %v389_v31  ;;  %v669_v35 = vadd.f32 %v665_v29, %v389_v31 }
  0x99   : > { %v397_v39 = vmax.f32 %v393_v32, 0.0  ;;  %v398_v40 = vmax.f32 %v394_v33, 0.0  ;;  %v673_v41 = vmax.f32 %v669_v35, 0.0  ;;  %v672_v43 = vmax.f32 %v668_v34, 0.0  ;;  %v1118_v33 = vld [vmem:[%s1511_s3 + $0x10] sm:$0xff]  }
  0x9b   : > { %v1081_v44 = vpack.i.bf16 %v398_v40, %v396_v38  ;;  %v436_v45 = vpack.c.bf16 %v398_v40, %v396_v38  ;;  %v1076_v46 = vpack.i.bf16 %v397_v39, %v395_v36  ;;  %v435_v47 = vpack.c.bf16 %v397_v39, %v395_v36 }
  0x9c   : > { %v1308_v50 = vpack.c.bf16 %v673_v41, %v671_v42  ;;  %v1310_v51 = vpack.c.bf16 %v672_v43, %v670_v48  ;;  %v1101_v52 = vpack.i.bf16 %v673_v41, %v671_v42  ;;  %v1096_v53 = vpack.i.bf16 %v672_v43, %v670_v48 }
  0x9d   : > { %1082 = vrot.lane.b32.xlu1 %v1081_v44, %s1182_s17  ;;  %460 = vmatprep.subr.bf16.mxu0 %v436_v45 }
  0x9e   : > { %1077 = vrot.lane.b32.xlu0 %v1076_v46, %s1182_s17  ;;  %461 = vmatpush1.bf16.msra.mxu0 %v435_v47 }
  0xa1   : > { %1092 = vrot.lane.b32.xlu1 %v1081_v44, %s1183_s20  ;;  %980 = vmatmul.mubr.msk.bf16.vlgmr.msra.gmra.mxu0 %vm442_vm0, %v1306_v49 }
  0xa2   : > { %1087 = vrot.lane.b32.xlu0 %v1076_v46, %s1183_s20  ;;  %582 = vmatprep.mubr.bf16.mxu0 %v1181_v2 }
  0xa5   : > { %1102 = vrot.lane.b32.xlu1 %v1101_v52, %s1182_s17 }
  0xa6   : > { %1097 = vrot.lane.b32.xlu0 %v1096_v53, %s1182_s17  ;;  %s968_s17 = sshll.u32 %s317_s25, 6 }
  0xa7   : > { %s1435_s18 = scalar_lea.vmem [#allocation2], %s968_s17 }
  0xa9   : > { %1112 = vrot.lane.b32.xlu1 %v1101_v52, %s1183_s20 }
  0xaa   : > { %1107 = vrot.lane.b32.xlu0 %v1096_v53, %s1183_s20  ;;  %s890_s20 = sshll.u32 %s1435_s18, 4  ;;  %s1462_s20 = int_to_ptr.vmem [resolvable:$true] %s890_s20 }
  0xab   : > { %s1119_s24 = scalar_lea.vmem %s1462_s20, 1024  ;;  %p1126_p0 = scmp.lt.s32.totalorder %s1462_s20, %s1124_s10 }
  0xac   : > { %p1120_p11 = scmp.ne.s32.totalorder %s1462_s20, %s1119_s24  ;;  %p1127_p1 = scmp.lt.s32.totalorder %s1125_s12, %s1119_s24 }
  0xad   : > { %604 = vperm.xlu1 %1075, %v352_v54  }
  0xae   : > { %599 = vperm.xlu0 %1074, %v351_v55   ;;  %p1121_p12 = pnand %p1120_p11, %p1270_p5  ;;  %p1128_p2 = por %p1127_p1, %p1126_p0 }
  0xb0   : > { %p1122_p13 = pneg %p1121_p12 }
  0xb1   : > { %618 = vperm.xlu1 %1075, %v358_v56  }
  0xb2   : > { %613 = vperm.xlu0 %1074, %v357_v57   ;;  %p1129_p3 = pnand %p1128_p2, %p1122_p13 }
  0xb5   : > { %632 = vperm.xlu1 %1075, %v360_v58  }
  0xb6   : > { %627 = vperm.xlu0 %1074, %v359_v59  }
 0x10f   : > { %v1083_v63 = vpop.permute.xlu1 %1082 }
 0x110   : > { %v1085_v0 = vunpack.i.h.bf16 %v1083_v63  ;;  %v1084_v1 = vunpack.i.l.bf16 %v1083_v63  ;;  %v1078_v3 = vpop.permute.xlu0 %1077 }
 0x111   : > { %v1080_v4 = vunpack.i.h.bf16 %v1078_v3  ;;  %v1079_v5 = vunpack.i.l.bf16 %v1078_v3 }
 0x113   : > { %v1093_v6 = vpop.permute.xlu1 %1092  ;;  %v408_v7 = vsel %vm407_vm1, %v1079_v5, %v1084_v1  ;;  %v409_v8 = vsel %vm407_vm1, %v1080_v4, %v1085_v0  ;;  %v410_v9 = vsel %vm407_vm1, %v1084_v1, %v1079_v5  ;;  %v411_v10 = vsel %vm407_vm1, %v1085_v0, %v1080_v4 }
 0x114   : > { %v1095_v11 = vunpack.i.h.bf16 %v1093_v6  ;;  %v1094_v12 = vunpack.i.l.bf16 %v1093_v6  ;;  %v1088_v13 = vpop.permute.xlu0 %1087  ;;  %v434_v14 = vpack.c.bf16 %v409_v8, %v408_v7  ;;  %v985_v16 = vpack.c.bf16 %v411_v10, %v410_v9 }
 0x115   : > { %v1090_v17 = vunpack.i.h.bf16 %v1088_v13  ;;  %v1089_v18 = vunpack.i.l.bf16 %v1088_v13 }
 0x116   : > { %511 = vmatprep.subr.bf16.mxu1 %v434_v14 }
 0x117   : > { %v426_v20 = vsel %vm424_vm3, %v1090_v17, %v1095_v11  ;;  %v428_v21 = vsel %vm424_vm3, %v1095_v11, %v1090_v17  ;;  %v425_v22 = vsel %vm424_vm3, %v1089_v18, %v1094_v12  ;;  %v427_v23 = vsel %vm424_vm3, %v1094_v12, %v1089_v18  ;;  %986 = vmatpush1.bf16.msk.msra.mxu1 %vm1347_vm5, %v985_v16  ;;  %v1103_v24 = vpop.permute.xlu1 %1102 }
 0x118   : > { %v540_v26 = vpack.c.bf16 %v426_v20, %v425_v22  ;;  %v992_v27 = vpack.c.bf16 %v428_v21, %v427_v23  ;;  %v1105_v28 = vunpack.i.h.bf16 %v1103_v24  ;;  %v1104_v29 = vunpack.i.l.bf16 %v1103_v24  ;;  %v1098_v30 = vpop.permute.xlu0 %1097  ;;  %724 = vmatprep.subr.bf16.mxu1 %v1308_v50  ;;  %v640_v22 = vld [vmem:[%s1416_s13 + $0x8] sm:$0xff] }
 0x119   : > { %v1100_v31 = vunpack.i.h.bf16 %v1098_v30  ;;  %v1099_v32 = vunpack.i.l.bf16 %v1098_v30  ;;  %v641_v30 = vld [vmem:[%s1416_s13 + $0x10] sm:$0xff] }
 0x11a   : > { %987 = vmatmul.mubr.msk.bf16.vlgmr.msra.gmra.mxu1 %vm442_vm0, %v1117_v19  ;;  %993 = vmatprep.subr.msk.bf16.mxu0 %vm1366_vm6, %v992_v27 }
 0x11b   : > { %v685_v34 = vsel %vm407_vm1, %v1105_v28, %v1100_v31  ;;  %v684_v35 = vsel %vm407_vm1, %v1104_v29, %v1099_v32  ;;  %565 = vmatpush1.bf16.msra.mxu0 %v540_v26  ;;  %725 = vmatpush1.bf16.msra.mxu1 %v1310_v51  ;;  %v1113_v36 = vpop.permute.xlu1 %1112  ;;  %v682_v37 = vsel %vm407_vm1, %v1099_v32, %v1104_v29 }
 0x11c   : > { %v1001_v38 = vpack.c.bf16 %v685_v34, %v684_v35  ;;  %v1115_v39 = vunpack.i.h.bf16 %v1113_v36  ;;  %v1114_v40 = vunpack.i.l.bf16 %v1113_v36  ;;  %v1108_v41 = vpop.permute.xlu0 %1107  ;;  %v683_v42 = vsel %vm407_vm1, %v1100_v31, %v1105_v28  ;;  %742 = vmatprep.mubr.bf16.mxu1 %v1181_v2 }
 0x11d   : > { %v1110_v43 = vunpack.i.h.bf16 %v1108_v41  ;;  %v1109_v44 = vunpack.i.l.bf16 %v1108_v41  ;;  %v707_v45 = vpack.c.bf16 %v683_v42, %v682_v37  ;;  %v642_v37 = vld [vmem:[%s1416_s13 + $0x18] sm:$0xff] }
 0x11e   : > { %994 = vmatmul.mubr.msk.bf16.vlgmr.msra.gmra.mxu0 %vm442_vm0, %v1118_v33 }
 0x11f   : > { %v699_v46 = vsel %vm424_vm3, %v1110_v43, %v1115_v39  ;;  %v701_v47 = vsel %vm424_vm3, %v1115_v39, %v1110_v43  ;;  %v698_v48 = vsel %vm424_vm3, %v1109_v44, %v1114_v40  ;;  %v700_v50 = vsel %vm424_vm3, %v1114_v40, %v1109_v44  ;;  %767 = vmatprep.subr.bf16.mxu0 %v707_v45 }
 0x120   : > { %v796_v51 = vpack.c.bf16 %v699_v46, %v698_v48  ;;  %v1007_v52 = vpack.c.bf16 %v701_v47, %v700_v50  ;;  %1002 = vmatpush1.bf16.msk.msra.mxu0 %vm1347_vm5, %v1001_v38  ;;  %785 = vmatprep.mubr.bf16.mxu0 %v1181_v2 }
 0x122   : > { %997 = vmatmul.mubr.msk.bf16.vlgmr.msra.gmra.mxu1 %vm442_vm0, %v1306_v49  ;;  %1008 = vmatprep.subr.msk.bf16.mxu1 %vm1366_vm6, %v1007_v52 }
 0x123   : > { %813 = vmatpush1.bf16.msra.mxu1 %v796_v51  ;;  %830 = vmatprep.mubr.bf16.mxu1 %v1181_v2 }
 0x126   : > { %1003 = vmatmul.mubr.msk.bf16.vlgmr.msra.gmra.mxu0 %vm442_vm0, %v1117_v19 }
 0x128   : > { %v1408_v58 = vpop.permute.xlu1 %604 }
 0x129   : > { %v1406_v55 = vpop.permute.xlu0 %599 }
 0x12a   : > { %1009 = vmatmul.mubr.msk.bf16.vlgmr.msra.gmra.mxu1 %vm442_vm0, %v1118_v33 }
 0x12c   : > { %v1418_v4 = vpop.permute.xlu1 %618 }
 0x12d   : > { %v1410_v60 = vpop.permute.xlu0 %613 }
 0x130   : > { %v633_v25 = vpop.permute.xlu1 %632 }
 0x131   : > { %v628_v10 = vpop.permute.xlu0 %627 }
 0x161   : > { %v480_v53 = vpop.f32.mrf.mxu0 }
 0x163   : > { %v482_v54 = vpop.f32.mrf.mxu0 }
 0x165   : > { %v484_v56 = vpop.f32.mrf.mxu0 }
 0x167   : > { %v486_v49 = vpop.f32.mrf.mxu0 }
 0x1da   : > { %v531_v57 = vpop.f32.mrf.mxu1 }
 0x1db   : > { %v532_v61 = vadd.f32 %v531_v57, %v480_v53 }
 0x1dc   : > { %v533_v59 = vpop.f32.mrf.mxu1 }
 0x1dd   : > { %v534_v63 = vadd.f32 %v533_v59, %v482_v54 }
 0x1de   : > { %v535_v2 = vpop.f32.mrf.mxu1  ;;  %v584_v62 = vpop.f32.mrf.mxu0 }
 0x1df   : > { %v593_v0 = vadd.f32 %v584_v62, %v532_v61  ;;  %v536_v5 = vadd.f32 %v535_v2, %v484_v56  ;;  %v1010_v62 = vld [vmem:[%s1416_s13 + $0x20] sm:$0xff] }
 0x1e0   : > { %v537_v1 = vpop.f32.mrf.mxu1  ;;  %v586_v3 = vpop.f32.mrf.mxu0 }
 0x1e1   : > { %v607_v6 = vadd.f32 %v1406_v55, %v593_v0  ;;  %v594_v7 = vadd.f32 %v586_v3, %v534_v63  ;;  %v538_v12 = vadd.f32 %v537_v1, %v486_v49 }
 0x1e2   : > { %v588_v8 = vpop.f32.mrf.mxu0  ;;  %v744_v9 = vpop.f32.mrf.mxu1 }
 0x1e3   : > { %v621_v11 = vmul.f32 %v1410_v60, %v607_v6  ;;  %v608_v13 = vadd.f32 %v1406_v55, %v594_v7  ;;  %v595_v14 = vadd.f32 %v588_v8, %v536_v5  ;;  %v1011_v5 = vld [vmem:[%s1416_s13 + $0x28] sm:$0xff] }
 0x1e4   : > { %v590_v16 = vpop.f32.mrf.mxu0  ;;  %v746_v17 = vpop.f32.mrf.mxu1 }
 0x1e5   : > { %v635_v18 = vadd.f32 %v628_v10, %v621_v11  ;;  %v622_v19 = vmul.f32 %v1410_v60, %v608_v13  ;;  %v609_v20 = vadd.f32 %v1408_v58, %v595_v14  ;;  %v596_v21 = vadd.f32 %v590_v16, %v538_v12  ;;  %v1013_v14 = vld [vmem:[%s1416_s13 + $0x38] sm:$0xff] }
 0x1e6   : > { %v748_v23 = vpop.f32.mrf.mxu1  ;;  %v787_v24 = vpop.f32.mrf.mxu0 }
 0x1e7   : > { %v643_v26 = vadd.f32 %v639_v15, %v635_v18  ;;  %v636_v27 = vadd.f32 %v628_v10, %v622_v19  ;;  %v623_v28 = vmul.f32 %v1418_v4, %v609_v20  ;;  %v610_v29 = vadd.f32 %v1408_v58, %v596_v21 }
 0x1e8   : > { %v750_v31 = vpop.f32.mrf.mxu1  ;;  %v789_v32 = vpop.f32.mrf.mxu0  ;;  %v788_v38 = vadd.f32 %v787_v24, %v744_v9  ;;  %v1012_v9 = vld [vmem:[%s1416_s13 + $0x30] sm:$0xff] }
 0x1e9   : > { %v647_v33 = vmax.f32 %v643_v26, 0.0  ;;  %v644_v34 = vadd.f32 %v640_v22, %v636_v27  ;;  %v637_v35 = vadd.f32 %v633_v25, %v623_v28  ;;  %v624_v36 = vmul.f32 %v1418_v4, %v610_v29 }
 0x1ea   : > { %v791_v39 = vpop.f32.mrf.mxu0  ;;  %v832_v40 = vpop.f32.mrf.mxu1  ;;  %v790_v44 = vadd.f32 %v789_v32, %v746_v17 }
 0x1eb   : > { %651 = vst [vmem:[%s1435_s18] sm:$0xff] %v647_v33  ;;  %v648_v41 = vmax.f32 %v644_v34, 0.0  ;;  %v645_v42 = vadd.f32 %v641_v30, %v637_v35  ;;  %v638_v43 = vadd.f32 %v633_v25, %v624_v36  ;;  %v841_v45 = vadd.f32 %v832_v40, %v788_v38 }
 0x1ec   : > { %v793_v46 = vpop.f32.mrf.mxu0  ;;  %v834_v47 = vpop.f32.mrf.mxu1  ;;  %v792_v51 = vadd.f32 %v791_v39, %v748_v23 }
 0x1ed   : > { %652 = vst [vmem:[%s1435_s18 + $0x8] sm:$0xff] %v648_v41  ;;  %v649_v48 = vmax.f32 %v645_v42, 0.0  ;;  %v646_v50 = vadd.f32 %v642_v37, %v638_v43  ;;  %v842_v52 = vadd.f32 %v834_v47, %v790_v44  ;;  %v845_v53 = vadd.f32 %v841_v45, %v1406_v55 }
 0x1ee   : > { %v836_v54 = vpop.f32.mrf.mxu1  ;;  %v794_v57 = vadd.f32 %v793_v46, %v750_v31 }
 0x1ef   : > { %653 = vst [vmem:[%s1435_s18 + $0x10] sm:$0xff] %v649_v48  ;;  %v650_v56 = vmax.f32 %v646_v50, 0.0  ;;  %v846_v49 = vadd.f32 %v842_v52, %v1406_v55  ;;  %v843_v59 = vadd.f32 %v836_v54, %v792_v51  ;;  %v849_v61 = vmul.f32 %v845_v53, %v1410_v60 }
 0x1f0   : > { %v838_v2 = vpop.f32.mrf.mxu1 }
 0x1f1   : > { %654 = vst [vmem:[%s1435_s18 + $0x18] sm:$0xff] %v650_v56  ;;  %v850_v63 = vmul.f32 %v846_v49, %v1410_v60  ;;  %v847_v0 = vadd.f32 %v843_v59, %v1408_v58  ;;  %v844_v1 = vadd.f32 %v838_v2, %v794_v57  ;;  %v853_v3 = vadd.f32 %v849_v61, %v628_v10 }
 0x1f3   : > { %v854_v6 = vadd.f32 %v850_v63, %v628_v10  ;;  %v851_v55 = vmul.f32 %v847_v0, %v1418_v4  ;;  %v848_v7 = vadd.f32 %v844_v1, %v1408_v58  ;;  %v862_v8 = vadd.f32 %v1010_v62, %v853_v3 }
 0x1f5   : > { %v863_v11 = vadd.f32 %v1011_v5, %v854_v6  ;;  %v855_v12 = vadd.f32 %v851_v55, %v633_v25  ;;  %v852_v60 = vmul.f32 %v848_v7, %v1418_v4  ;;  %v866_v13 = vmax.f32 %v862_v8, 0.0 }
 0x1f7   : > { %v867_v15 = vmax.f32 %v863_v11, 0.0  ;;  %v864_v16 = vadd.f32 %v1012_v9, %v855_v12  ;;  %v856_v10 = vadd.f32 %v852_v60, %v633_v25  ;;  %1014 = vst [vmem:[%s1435_s18 + $0x20] sm:$0xff] %v866_v13 }
 0x1f9   : > { %1015 = vst [vmem:[%s1435_s18 + $0x28] sm:$0xff] %v867_v15  ;;  %v868_v58 = vmax.f32 %v864_v16, 0.0  ;;  %v865_v17 = vadd.f32 %v1013_v14, %v856_v10 }
 0x1fb   : > { %1016 = vst [vmem:[%s1435_s18 + $0x30] sm:$0xff] %v868_v58  ;;  %v869_v4 = vmax.f32 %v865_v17, 0.0 }
 0x1fd   : > { %1017 = vst [vmem:[%s1435_s18 + $0x38] sm:$0xff] %v869_v4 }
 0x1fe   : > { %1132 = shalt.err (!%p1129_p3)
}
 0x1ff   : > { %s1133_s13 = scalar_lea.hbm %s1460_s23, 1024  ;;  %s1137_s18 = scalar_lea.hbm %s1516_s8, 2048 }
 0x200   : > { %p1134_p4 = scmp.ne.s32.totalorder %s1460_s23, %s1133_s13  ;;  %p1138_p9 = scmp.lt.s32.totalorder %s1460_s23, %s1516_s8 }
 0x201   : > { %p1139_p10 = scmp.lt.s32.totalorder %s1137_s18, %s1133_s13 }
 0x202   : > { %p1135_p7 = pnand %p1134_p4, %p1270_p5 }
 0x203   : > { %p1140_p11 = por %p1139_p10, %p1138_p9 }
 0x204   : > { %p1136_p8 = pneg %p1135_p7 }
 0x206   : > { %p1141_p12 = pnand %p1140_p11, %p1136_p8 }
 0x208   : > { %1144 = shalt.err (!%p1141_p12)
}
 0x209   : > { %s1185_s22 = smov 256   ;;  %s1186_s24 = smov 16  }
 0x20a   : > { %1030 = dma.vmem_to_hbm [thread:$0]  (%p1270_p5), %s1462_s20, 1024, %s1460_s23, %s1468_s9, %s1185_s22, %s1185_s22, %s1186_s24  }
 0x20b PF: > { %p1036_p13 = scmp.ge.s32.totalorder %s1179_s30, 2  ;;  %s905_s26 = sand.u32 1, %s1167_s27  }
 0x20c   : > { %s906_s10 = scalar_lea.sflag [#allocation3], %s905_s26 }
 0x20d   : > { %p1033_p0 = pnand %p1036_p13, %p1274_p6 }
 0x20f   : > { %p1034_p1 = pneg %p1033_p0 }
 0x211   : > { %1162 = dma.done.wait (%p1034_p1), %s906_s10, 1024  }
 0x212   : > { %1164 = vsyncadd (%p1034_p1), %s906_s10, 4294966272  ;;  %p18_p2 = scmp.ge.s32.totalorder %s1257_s11, 4   ;;  %s1523_s27 = smov %s1171_s28 }
 0x213   : > { %s1524_s28 = smov %s1175_s29  ;;  %s1525_s29 = smov %s1268_s14 }
 0x214   : > { %s1526_s30 = smov %s1257_s11  ;;  %20 = sbr.rel (!%p18_p2) target bundleno = 3 (0x3), region = 95 }
 0x219   :  { %911 = vsyncpa [#allocation3], 1 }
 0x21a   :  { %913 = vsyncpa [#allocation3 + $0x1], 1 }

</bundles_post_ra>
